<compile_context>
chip_gen: v7x
topology: tpu7x:2x2x1
jax: 0.10.0
libtpu: 0.0.40
codegen_flags: <defaults>
</compile_context>

<pallas_src>
import functools
import math

import jax
import jax.numpy as jnp
from jax import lax
from jax.experimental import pallas as pl
from jax.experimental.pallas import tpu as pltpu


# ---------------------------------------------------------------------------
# Generation-aware VMEM budget
# ---------------------------------------------------------------------------
@functools.lru_cache(maxsize=None)
def _vmem_limit_bytes():
    cap = 128 * 1024 * 1024
    try:
        cap = int(getattr(pltpu.get_tpu_info(), "vmem_capacity_bytes", cap))
    except Exception:
        pass
    # 64 MiB on v5e/v6e (128 MiB physical), ~48 MiB on v7x (64 MiB physical).
    return int(min(64 * 1024 * 1024, cap * 3 // 4))


# ---------------------------------------------------------------------------
# In-kernel helpers (traced inside pallas kernels, f32 math)
# ---------------------------------------------------------------------------
def _layernorm(x, g, eps=1e-5):
    # x: (T, C) f32, g: (1, C) f32.  Matches F.layer_norm (biased var), bias=None.
    mu = jnp.mean(x, axis=-1, keepdims=True)
    xc = x - mu
    var = jnp.mean(xc * xc, axis=-1, keepdims=True)
    return xc * lax.rsqrt(var + eps) * g


def _gelu_exact(x):
    # nn.GELU() default = exact erf-based GELU.
    return 0.5 * x * (1.0 + lax.erf(x * (1.0 / math.sqrt(2.0))))


# ---------------------------------------------------------------------------
# Tile-size helpers (respect the (8,128) BlockSpec constraint)
# ---------------------------------------------------------------------------
def _sublane_tile(n, pref):
    if n <= pref:
        return n
    t = (pref // 8) * 8
    while t >= 8:
        if n % t == 0:
            return t
        t -= 8
    return n


def _lane_tile(n, pref):
    if n <= pref:
        return n
    t = (pref // 128) * 128
    while t >= 128:
        if n % t == 0:
            return t
        t -= 128
    return n


# ---------------------------------------------------------------------------
# Kernel 1: ln1 + fused QKV projection, lane-dense outputs.  Grid: (B, T_tiles)
# (softmax 1/sqrt(D) scale is pre-folded into the q columns of w_qkv)
# ---------------------------------------------------------------------------
def _qkv_kernel(x_ref, g_ref, wqkv_ref, q_ref, k_ref, v_ref):
    c = x_ref.shape[-1]
    h = _layernorm(x_ref[0], g_ref[...]).astype(jnp.bfloat16)
    qkv = jnp.dot(h, wqkv_ref[...], preferred_element_type=jnp.float32)  # (TQ, 3C)
    q_ref[0] = qkv[:, 0 * c:1 * c].astype(jnp.bfloat16)   # full-width (TQ, C) stores
    k_ref[0] = qkv[:, 1 * c:2 * c].astype(jnp.bfloat16)
    v_ref[0] = qkv[:, 2 * c:3 * c].astype(jnp.bfloat16)


# ---------------------------------------------------------------------------
# Kernel 2: flash attention (online softmax over KV tiles, heads batched into
#           one 3-D einsum) + single-matmul output projection + residual.
#           Grid: (B, Tq_tiles, Tkv_tiles), TQ == TK.
# ---------------------------------------------------------------------------
def _attn_kernel(x_ref, q_ref, k_ref, v_ref, wo_ref, o_ref,
                 m_sc, l_sc, acc_sc, *, num_heads):
    qi = pl.program_id(1)
    ki = pl.program_id(2)
    tq = q_ref.shape[1]
    tk = k_ref.shape[1]
    c = q_ref.shape[2]
    d = c // num_heads

    @pl.when(ki == 0)
    def _init():
        m_sc[...] = jnp.full_like(m_sc, -jnp.inf)
        l_sc[...] = jnp.zeros_like(l_sc)
        acc_sc[...] = jnp.zeros_like(acc_sc)

    def _split_heads(a):  # (TN, C) -> (H, TN, D), static lane slices + major-dim stack
        return jnp.stack([a[:, hi * d:(hi + 1) * d] for hi in range(num_heads)],
                         axis=0)

    def _scores():
        q3 = _split_heads(q_ref[0])
        k3 = _split_heads(k_ref[0])
        return jnp.einsum("hqd,hkd->hqk", q3, k3,
                          preferred_element_type=jnp.float32)   # (H, TQ, TK)

    def _online_update(s):
        v3 = _split_heads(v_ref[0])
        m_prev = m_sc[...]
        m_new = jnp.maximum(m_prev, jnp.max(s, axis=-1, keepdims=True))
        alpha = jnp.exp(m_prev - m_new)
        p = jnp.exp(s - m_new)
        l_sc[...] = alpha * l_sc[...] + jnp.sum(p, axis=-1, keepdims=True)
        acc_sc[...] = alpha * acc_sc[...] + jnp.einsum(
            "hqk,hkd->hqd", p.astype(jnp.bfloat16), v3,
            preferred_element_type=jnp.float32)
        m_sc[...] = m_new

    # Fully-visible tiles (strictly below the causal diagonal): no mask needed.
    @pl.when(ki < qi)
    def _full_tile():
        _online_update(_scores())

    # Diagonal tile: apply the causal mask (TQ == TK, so local iotas suffice).
    @pl.when(ki == qi)
    def _diag_tile():
        s = _scores()
        row = lax.broadcasted_iota(jnp.int32, (tq, tk), 0)
        col = lax.broadcasted_iota(jnp.int32, (tq, tk), 1)
        s = jnp.where((col <= row)[None, :, :], s, -1e30)
        _online_update(s)

    # ki > qi: fully masked -> no compute; the k/v index_maps are clamped so no
    # new KV DMA is issued for these steps either.

    @pl.when(ki == pl.num_programs(2) - 1)
    def _finalize():
        y = acc_sc[...] * pl.reciprocal(l_sc[...], approx=True)     # (H, TQ, D) f32
        y_flat = jnp.concatenate([y[hi] for hi in range(num_heads)],
                                 axis=-1).astype(jnp.bfloat16)       # (TQ, C)
        # Single K=C out-projection MXU pass (was H matmuls with K=D).
        o_ref[0] = x_ref[0] + jnp.dot(y_flat, wo_ref[...],
                                      preferred_element_type=jnp.float32)


# ---------------------------------------------------------------------------
# Kernel 3: ln2 + MLP (tiled over the 4C hidden dim) + residual.
#           Grid: (B, T_tiles, F_tiles)
# ---------------------------------------------------------------------------
def _mlp_kernel(x_ref, g_ref, wfc_ref, wpr_ref, o_ref, h_sc, acc_sc):
    fi = pl.program_id(2)

    @pl.when(fi == 0)
    def _init():
        h_sc[...] = _layernorm(x_ref[0], g_ref[...]).astype(jnp.bfloat16)
        acc_sc[...] = jnp.zeros_like(acc_sc)

    f = jnp.dot(h_sc[...], wfc_ref[...], preferred_element_type=jnp.float32)  # (TQ, TF)
    f = _gelu_exact(f).astype(jnp.bfloat16)
    acc_sc[...] += jnp.dot(f, wpr_ref[...], preferred_element_type=jnp.float32)

    @pl.when(fi == pl.num_programs(2) - 1)
    def _fin():
        o_ref[0] = x_ref[0] + acc_sc[...]


# ---------------------------------------------------------------------------
# Kernel 4: ln_f + lm_head, tiled over the (padded) vocab.
#           ln_f(x) is computed once per token tile (at v == 0) into scratch.
#           Grid: (B, T_tiles, V_tiles)
# ---------------------------------------------------------------------------
def _head_kernel(x_ref, g_ref, w_ref, o_ref, h_sc):
    @pl.when(pl.program_id(2) == 0)
    def _init():
        h_sc[...] = _layernorm(x_ref[0], g_ref[...]).astype(jnp.bfloat16)

    o_ref[0] = jnp.dot(h_sc[...], w_ref[...], preferred_element_type=jnp.float32)


# ---------------------------------------------------------------------------
# Wrappers
# ---------------------------------------------------------------------------
def transformer_block(x, lp, num_heads):
    B, T, C = x.shape
    bf = jnp.bfloat16
    vmem = _vmem_limit_bytes()

    TQm = _sublane_tile(T, 256)       # token tile for projection / MLP matmuls
    nTm = T // TQm
    TQa = _sublane_tile(T, 128)       # token tile for attention (q and kv share it)
    nTa = T // TQa

    # ---- 1. ln1 + QKV projection (lane-dense (B,T,C) bf16 outputs) ----
    q, k, v = pl.pallas_call(
        _qkv_kernel,
        out_shape=(jax.ShapeDtypeStruct((B, T, C), bf),
                   jax.ShapeDtypeStruct((B, T, C), bf),
                   jax.ShapeDtypeStruct((B, T, C), bf)),
        grid=(B, nTm),
        in_specs=[
            pl.BlockSpec((1, TQm, C), lambda b, t: (b, t, 0)),
            pl.BlockSpec((1, C), lambda b, t: (0, 0)),
            # TODO(synk): single-buffer resident weights (pipeline_mode=pl.Buffered(1))
            # or tile the 3C dim for very large C on v7x's 64 MiB VMEM.
            pl.BlockSpec((C, 3 * C), lambda b, t: (0, 0)),
        ],
        out_specs=(pl.BlockSpec((1, TQm, C), lambda b, t: (b, t, 0)),
                   pl.BlockSpec((1, TQm, C), lambda b, t: (b, t, 0)),
                   pl.BlockSpec((1, TQm, C), lambda b, t: (b, t, 0))),
        compiler_params=pltpu.CompilerParams(
            dimension_semantics=("parallel", "parallel"),
            vmem_limit_bytes=vmem),
        cost_estimate=pl.CostEstimate(
            flops=int(2 * B * T * C * 3 * C),
            transcendentals=0,
            bytes_accessed=int(4 * B * T * C + 2 * C * 3 * C + 3 * 2 * B * T * C)),
    )(x, lp["ln1_g"], lp["w_qkv"])

    # ---- 2. flash attention + out-proj + residual ----
    D = C // num_heads

    def kv_map(b, qi, ki):
        # Clamp above-diagonal KV tiles to the last useful block: the block index
        # then doesn't change across skipped steps, so Pallas skips the DMA.
        return (b, jnp.minimum(ki, qi), 0)

    x = pl.pallas_call(
        functools.partial(_attn_kernel, num_heads=num_heads),
        out_shape=jax.ShapeDtypeStruct((B, T, C), x.dtype),
        grid=(B, nTa, nTa),
        in_specs=[
            pl.BlockSpec((1, TQa, C), lambda b, qi, ki: (b, qi, 0)),   # x (residual)
            pl.BlockSpec((1, TQa, C), lambda b, qi, ki: (b, qi, 0)),   # q
            pl.BlockSpec((1, TQa, C), kv_map),                         # k
            pl.BlockSpec((1, TQa, C), kv_map),                         # v
            pl.BlockSpec((C, C), lambda b, qi, ki: (0, 0)),            # w_o
        ],
        out_specs=pl.BlockSpec((1, TQa, C), lambda b, qi, ki: (b, qi, 0)),
        scratch_shapes=[
            pltpu.VMEM((num_heads, TQa, 1), jnp.float32),   # m
            pltpu.VMEM((num_heads, TQa, 1), jnp.float32),   # l
            pltpu.VMEM((num_heads, TQa, D), jnp.float32),   # acc
        ],
        compiler_params=pltpu.CompilerParams(
            dimension_semantics=("parallel", "parallel", "arbitrary"),
            vmem_limit_bytes=vmem),
        cost_estimate=pl.CostEstimate(
            flops=int(4 * B * num_heads * T * T * D + 2 * B * T * C * C),
            transcendentals=int(B * num_heads * T * T),
            bytes_accessed=int(3 * 2 * B * T * C + 2 * 4 * B * T * C + 2 * C * C)),
    )(x, q, k, v, lp["w_o"])

    # ---- 3. ln2 + MLP (hidden dim tiled, accumulated) + residual ----
    F = 4 * C
    TF = _lane_tile(F, 512)
    nF = F // TF
    x = pl.pallas_call(
        _mlp_kernel,
        out_shape=jax.ShapeDtypeStruct((B, T, C), x.dtype),
        grid=(B, nTm, nF),
        in_specs=[
            pl.BlockSpec((1, TQm, C), lambda b, t, f: (b, t, 0)),
            pl.BlockSpec((1, C), lambda b, t, f: (0, 0)),
            pl.BlockSpec((C, TF), lambda b, t, f: (0, f)),
            pl.BlockSpec((TF, C), lambda b, t, f: (f, 0)),
        ],
        out_specs=pl.BlockSpec((1, TQm, C), lambda b, t, f: (b, t, 0)),
        scratch_shapes=[
            pltpu.VMEM((TQm, C), jnp.bfloat16),             # ln2(x), computed once
            pltpu.VMEM((TQm, C), jnp.float32),              # MLP output accumulator
        ],
        compiler_params=pltpu.CompilerParams(
            dimension_semantics=("parallel", "parallel", "arbitrary"),
            vmem_limit_bytes=vmem),
        cost_estimate=pl.CostEstimate(
            flops=int(4 * B * T * C * F),
            transcendentals=int(B * T * F),
            bytes_accessed=int(2 * 4 * B * T * C + 2 * 2 * C * F)),
    )(x, lp["ln2_g"], lp["w_fc"], lp["w_pr"])
    return x


def lm_head(x, ln_f_g, w_head):
    # w_head is already padded to a vocab multiple of 128 (see init_params).
    B, T, C = x.shape
    Vp = w_head.shape[1]
    TQ = _sublane_tile(T, 256)
    TV = _lane_tile(Vp, 512)
    vmem = _vmem_limit_bytes()
    return pl.pallas_call(
        _head_kernel,
        out_shape=jax.ShapeDtypeStruct((B, T, Vp), x.dtype),
        grid=(B, T // TQ, Vp // TV),
        in_specs=[
            pl.BlockSpec((1, TQ, C), lambda b, t, v: (b, t, 0)),
            pl.BlockSpec((1, C), lambda b, t, v: (0, 0)),
            pl.BlockSpec((C, TV), lambda b, t, v: (0, v)),
        ],
        out_specs=pl.BlockSpec((1, TQ, TV), lambda b, t, v: (b, t, v)),
        scratch_shapes=[pltpu.VMEM((TQ, C), jnp.bfloat16)],   # ln_f(x), computed once
        compiler_params=pltpu.CompilerParams(
            dimension_semantics=("parallel", "parallel", "arbitrary"),
            vmem_limit_bytes=vmem),
        cost_estimate=pl.CostEstimate(
            flops=int(2 * B * T * C * Vp),
            transcendentals=0,
            bytes_accessed=int(4 * B * T * C + 2 * C * Vp + 4 * B * T * Vp)),
    )(x, ln_f_g, w_head)


# ---------------------------------------------------------------------------
# Parameter construction (deterministic; mirrors GPT2mm.__init__ shapes).
# Linear weights stored pre-transposed as (in, out) and cast to bf16 for the MXU.
# The tied lm_head weight is pre-transposed / vocab-padded / cast ONCE here, and
# the attention softmax scale is pre-folded into the q columns of w_qkv.
# ---------------------------------------------------------------------------
def init_params(key, n_layers, vocab_size, n_embd, n_heads, block_size):
    bf = jnp.bfloat16
    d = n_embd // n_heads
    scale = 1.0 / math.sqrt(d)
    v_pad = ((vocab_size + 127) // 128) * 128

    def nrm(k, shape, std):
        return std * jax.random.normal(k, shape, jnp.float32)

    keys = jax.random.split(key, 2 + 4 * n_layers)
    wte = nrm(keys[0], (vocab_size, n_embd), 0.02)
    w_head = jnp.zeros((n_embd, v_pad), jnp.float32)
    w_head = w_head.at[:, :vocab_size].set(wte.T)
    params = {
        "wte": wte,                                 # (V, C) f32, embedding gather
        "w_head": w_head.astype(bf),                # tied lm_head weight, (C, Vpad) bf16
        "wpe": nrm(keys[1], (block_size, n_embd), 0.02),
        "ln_f_g": jnp.ones((1, n_embd), jnp.float32),
        "blocks": [],
    }
    proj_std = 0.02 / math.sqrt(2 * n_layers)
    for l in range(n_layers):
        kq, ko, kf, kp = keys[2 + 4 * l: 2 + 4 * (l + 1)]
        w_qkv = nrm(kq, (n_embd, 3 * n_embd), 0.02)
        w_qkv = jnp.concatenate(
            [w_qkv[:, :n_embd] * scale, w_qkv[:, n_embd:]], axis=1)   # fold 1/sqrt(D)
        params["blocks"].append({
            "ln1_g": jnp.ones((1, n_embd), jnp.float32),
            "w_qkv": w_qkv.astype(bf),
            "w_o": nrm(ko, (n_embd, n_embd), proj_std).astype(bf),    # (C, C) single matmul
            "ln2_g": jnp.ones((1, n_embd), jnp.float32),
            "w_fc": nrm(kf, (n_embd, 4 * n_embd), 0.02).astype(bf),
            "w_pr": nrm(kp, (4 * n_embd, n_embd), proj_std).astype(bf),
        })
    return params


# ---------------------------------------------------------------------------
# Full forward (embedding gather is plain-JAX glue; hot path is in kernels)
# ---------------------------------------------------------------------------
def gpt2mm_forward(idx, params, num_heads, prediction=False):
    B, T = idx.shape
    V = params["wte"].shape[0]
    # TODO(synk): token-embedding gather stays in XLA (irregular gather).
    tok_emb = jnp.take(params["wte"], idx, axis=0)          # (B, T, C)
    pos_emb = params["wpe"][:T][None]                       # (1, T, C)
    x = tok_emb + pos_emb                                   # dropout = identity (eval)
    for lp in params["blocks"]:
        x = transformer_block(x, lp, num_heads)
    if prediction:
        # Fold B into the matmul M dim (M=B rows instead of M=1 per batch element).
        x_last = x[:, -1, :][None]                                    # (1, B, C)
        logits = lm_head(x_last, params["ln_f_g"], params["w_head"])  # (1, B, Vpad)
        return logits[0, :, :V][:, None, :]                           # (B, 1, V)
    logits = lm_head(x, params["ln_f_g"], params["w_head"])           # (B, T, Vpad)
    return logits[..., :V]


if __name__ == "__main__":
    # Small but representative: multi-tile attention (T=256 > attention tile 128)
    # exercises the diagonal, fully-visible and skipped/clamped KV-tile paths,
    # and vocab 200 exercises the 128-padding + slice-back of the LM head.
    n_layers, vocab_size, n_embd, n_heads, block_size = 2, 200, 128, 4, 256
    B, T = 2, 256

    key = jax.random.PRNGKey(0)
    pkey, ikey = jax.random.split(key)
    params = init_params(pkey, n_layers, vocab_size, n_embd, n_heads, block_size)
    idx = jax.random.randint(ikey, (B, T), 0, vocab_size, dtype=jnp.int32)

    logits = gpt2mm_forward(idx, params, n_heads, prediction=False)
    logits = jax.block_until_ready(logits)
    assert logits.shape == (B, T, vocab_size)
    assert bool(jnp.all(jnp.isfinite(logits)))

    logits_last = gpt2mm_forward(idx, params, n_heads, prediction=True)
    logits_last = jax.block_until_ready(logits_last)
    assert logits_last.shape == (B, 1, vocab_size)
    assert bool(jnp.all(jnp.isfinite(logits_last)))

    print("KERNEL_OK")
</pallas_src>

<mosaic_0001>
module attributes {stable_mosaic.version = 11 : i64} {
  func.func @_qkv_kernel(%arg0: i32, %arg1: i32, %arg2: memref<1x256x128xf32, #tpu.memory_space<vmem>>, %arg3: memref<1x128xf32, #tpu.memory_space<vmem>>, %arg4: memref<128x384xbf16, #tpu.memory_space<vmem>>, %arg5: memref<1x256x128xbf16, #tpu.memory_space<vmem>>, %arg6: memref<1x256x128xbf16, #tpu.memory_space<vmem>>, %arg7: memref<1x256x128xbf16, #tpu.memory_space<vmem>>) attributes {dimension_semantics = [#tpu.dimension_semantics<parallel>, #tpu.dimension_semantics<parallel>], iteration_bounds = array<i64: 2, 1>, scalar_prefetch = 0 : i64, scratch_operands = 0 : i64, tpu.core_type = #tpu.core_type<tc>, window_params = [{transform_indices = @transform_0, window_bounds = array<i64: 1, 256, 128>}, {pipeline_mode = #tpu.pipeline_mode<synchronous>, transform_indices = @transform_1, window_bounds = array<i64: 1, 128>}, {pipeline_mode = #tpu.pipeline_mode<synchronous>, transform_indices = @transform_2, window_bounds = array<i64: 128, 384>}, {transform_indices = @transform_3, window_bounds = array<i64: 1, 256, 128>}, {transform_indices = @transform_4, window_bounds = array<i64: 1, 256, 128>}, {transform_indices = @transform_5, window_bounds = array<i64: 1, 256, 128>}]} {
    %c0 = arith.constant 0 : index
    %c0_0 = arith.constant 0 : index
    %c0_1 = arith.constant 0 : index
    %0 = vector.load %arg2[%c0, %c0_0, %c0_1] : memref<1x256x128xf32, #tpu.memory_space<vmem>>, vector<1x256x128xf32>
    %1 = vector.shape_cast %0 : vector<1x256x128xf32> to vector<256x128xf32>
    %c0_2 = arith.constant 0 : index
    %c0_3 = arith.constant 0 : index
    %2 = vector.load %arg3[%c0_2, %c0_3] : memref<1x128xf32, #tpu.memory_space<vmem>>, vector<1x128xf32>
    %cst = arith.constant dense<0.000000e+00> : vector<256xf32>
    %3 = vector.multi_reduction <add>, %1, %cst [1] : vector<256x128xf32> to vector<256xf32>
    %4 = vector.shape_cast %3 : vector<256xf32> to vector<256x1xf32>
    %cst_4 = arith.constant 1.280000e+02 : f32
    %5 = vector.broadcast %cst_4 : f32 to vector<256x1xf32>
    %6 = arith.divf %4, %5 : vector<256x1xf32>
    %7 = vector.broadcast %6 : vector<256x1xf32> to vector<256x128xf32>
    %8 = arith.subf %1, %7 : vector<256x128xf32>
    %9 = arith.mulf %8, %8 : vector<256x128xf32>
    %cst_5 = arith.constant dense<0.000000e+00> : vector<256xf32>
    %10 = vector.multi_reduction <add>, %9, %cst_5 [1] : vector<256x128xf32> to vector<256xf32>
    %11 = vector.shape_cast %10 : vector<256xf32> to vector<256x1xf32>
    %cst_6 = arith.constant 1.280000e+02 : f32
    %12 = vector.broadcast %cst_6 : f32 to vector<256x1xf32>
    %13 = arith.divf %11, %12 : vector<256x1xf32>
    %cst_7 = arith.constant 9.99999974E-6 : f32
    %14 = vector.broadcast %cst_7 : f32 to vector<256x1xf32>
    %15 = arith.addf %13, %14 : vector<256x1xf32>
    %16 = math.rsqrt %15 : vector<256x1xf32>
    %17 = vector.broadcast %16 : vector<256x1xf32> to vector<256x128xf32>
    %18 = arith.mulf %8, %17 : vector<256x128xf32>
    %19 = vector.broadcast %2 : vector<1x128xf32> to vector<256x128xf32>
    %20 = arith.mulf %18, %19 : vector<256x128xf32>
    %21 = arith.truncf %20 : vector<256x128xf32> to vector<256x128xbf16>
    %c0_8 = arith.constant 0 : index
    %c0_9 = arith.constant 0 : index
    %22 = vector.load %arg4[%c0_8, %c0_9] : memref<128x384xbf16, #tpu.memory_space<vmem>>, vector<128x384xbf16>
    %cst_10 = arith.constant dense<0.000000e+00> : vector<256x384xf32>
    %23 = tpu.matmul %21, %22, %cst_10 {dimension_numbers = #tpu.dot_dimension_numbers<[1], [0], [0], [1], [0, 0, 1, 1], [], []>} : vector<256x128xbf16>, vector<128x384xbf16>, vector<256x384xf32> -> vector<256x384xf32>
    %24 = vector.extract_strided_slice %23 {offsets = [0, 0], sizes = [256, 128], strides = [1, 1]} : vector<256x384xf32> to vector<256x128xf32>
    %25 = arith.truncf %24 : vector<256x128xf32> to vector<256x128xbf16>
    %c0_11 = arith.constant 0 : index
    %c0_12 = arith.constant 0 : index
    %c0_13 = arith.constant 0 : index
    %26 = vector.load %arg5[%c0_11, %c0_12, %c0_13] : memref<1x256x128xbf16, #tpu.memory_space<vmem>>, vector<1x256x128xbf16>
    %27 = vector.shape_cast %26 : vector<1x256x128xbf16> to vector<256x128xbf16>
    %28 = vector.shape_cast %25 : vector<256x128xbf16> to vector<1x256x128xbf16>
    tpu.vector_store %arg5[%c0_11, %c0_12, %c0_13], %28 {strides = array<i32>} : memref<1x256x128xbf16, #tpu.memory_space<vmem>>, vector<1x256x128xbf16>,
    %29 = vector.extract_strided_slice %23 {offsets = [0, 128], sizes = [256, 128], strides = [1, 1]} : vector<256x384xf32> to vector<256x128xf32>
    %30 = arith.truncf %29 : vector<256x128xf32> to vector<256x128xbf16>
    %c0_14 = arith.constant 0 : index
    %c0_15 = arith.constant 0 : index
    %c0_16 = arith.constant 0 : index
    %31 = vector.load %arg6[%c0_14, %c0_15, %c0_16] : memref<1x256x128xbf16, #tpu.memory_space<vmem>>, vector<1x256x128xbf16>
    %32 = vector.shape_cast %31 : vector<1x256x128xbf16> to vector<256x128xbf16>
    %33 = vector.shape_cast %30 : vector<256x128xbf16> to vector<1x256x128xbf16>
    tpu.vector_store %arg6[%c0_14, %c0_15, %c0_16], %33 {strides = array<i32>} : memref<1x256x128xbf16, #tpu.memory_space<vmem>>, vector<1x256x128xbf16>,
    %34 = vector.extract_strided_slice %23 {offsets = [0, 256], sizes = [256, 128], strides = [1, 1]} : vector<256x384xf32> to vector<256x128xf32>
    %35 = arith.truncf %34 : vector<256x128xf32> to vector<256x128xbf16>
    %c0_17 = arith.constant 0 : index
    %c0_18 = arith.constant 0 : index
    %c0_19 = arith.constant 0 : index
    %36 = vector.load %arg7[%c0_17, %c0_18, %c0_19] : memref<1x256x128xbf16, #tpu.memory_space<vmem>>, vector<1x256x128xbf16>
    %37 = vector.shape_cast %36 : vector<1x256x128xbf16> to vector<256x128xbf16>
    %38 = vector.shape_cast %35 : vector<256x128xbf16> to vector<1x256x128xbf16>
    tpu.vector_store %arg7[%c0_17, %c0_18, %c0_19], %38 {strides = array<i32>} : memref<1x256x128xbf16, #tpu.memory_space<vmem>>, vector<1x256x128xbf16>,
    return
  }
  func.func @transform_0(%arg0: i32, %arg1: i32) -> (i32, i32, i32) {
    %c0_i32 = arith.constant 0 : i32
    %c0_i32_0 = arith.constant 0 : i32
    return %arg0, %arg1, %c0_i32 : i32, i32, i32
  }
  func.func @transform_1(%arg0: i32, %arg1: i32) -> (i32, i32) {
    %c0_i32 = arith.constant 0 : i32
    %c0_i32_0 = arith.constant 0 : i32
    %c0_i32_1 = arith.constant 0 : i32
    return %c0_i32, %c0_i32_0 : i32, i32
  }
  func.func @transform_2(%arg0: i32, %arg1: i32) -> (i32, i32) {
    %c0_i32 = arith.constant 0 : i32
    %c0_i32_0 = arith.constant 0 : i32
    %c0_i32_1 = arith.constant 0 : i32
    return %c0_i32, %c0_i32_0 : i32, i32
  }
  func.func @transform_3(%arg0: i32, %arg1: i32) -> (i32, i32, i32) {
    %c0_i32 = arith.constant 0 : i32
    %c0_i32_0 = arith.constant 0 : i32
    return %arg0, %arg1, %c0_i32 : i32, i32, i32
  }
  func.func @transform_4(%arg0: i32, %arg1: i32) -> (i32, i32, i32) {
    %c0_i32 = arith.constant 0 : i32
    %c0_i32_0 = arith.constant 0 : i32
    return %arg0, %arg1, %c0_i32 : i32, i32, i32
  }
  func.func @transform_5(%arg0: i32, %arg1: i32) -> (i32, i32, i32) {
    %c0_i32 = arith.constant 0 : i32
    %c0_i32_0 = arith.constant 0 : i32
    return %arg0, %arg1, %c0_i32 : i32, i32, i32
  }
}

</mosaic_0001>

<bundles_post_ra>
// kernel: tpu_custom_call.1
= control target key start
LH: loop header
LB: loop body
LE: loop exit
PB: predicated region body
PF: predicated region fallthrough
CT: control target
= control target key end

     0   :  { %s3892_s0 = inlined_call_operand.hbm [shape: f32[2,256,128], index: 0, kind: input, shape index: {}]   ;;  %s3893_s1 = inlined_call_operand.hbm [shape: f32[1,128], index: 1, kind: input, shape index: {}]   ;;  %s3894_s2 = inlined_call_operand.hbm [shape: bf16[128,384], index: 2, kind: input, shape index: {}]   ;;  %s3895_s3 = inlined_call_operand.hbm [shape: bf16[2,256,128], index: 3, kind: output, shape index: {0}]   ;;  %s3896_s4 = inlined_call_operand.hbm [shape: bf16[2,256,128], index: 4, kind: output, shape index: {1}]   ;;  %s3897_s5 = inlined_call_operand.hbm [shape: bf16[2,256,128], index: 5, kind: output, shape index: {2}]  }
   0x1   :  { %3904 = sst [smem:[#allocation16_spill]] %s3893_s1 }
   0x2   :  { %11 = vsyncpa [#allocation3], 0 }
   0x3   :  { %13 = vsyncpa [#allocation3 + $0x1], 0 }
   0x4   :  { %14 = vsyncpa [#allocation6], 0 }
   0x5   :  { %15 = vsyncpa [#allocation4], 0 }
   0x6   :  { %17 = vsyncpa [#allocation4 + $0x1], 0 }
   0x7   :  { %18 = vsyncpa [#allocation10], 0 }
   0x8   :  { %20 = vsyncpa [#allocation10 + $0x1], 0  ;;  %s3078_s18 = smov 0   ;;  %s3080_s19 = smov 0  }
   0x9   :  { %s3082_s20 = smov 0   ;;  %s3084_s21 = smov 0  }
   0xa   :  { %s3086_s22 = smov 0   ;;  %s3088_s23 = smov 0  }
   0xb LB: > { %s3109_s24 = sadd.s32 4294967295, %s3033_s23   ;;  %s3903_s25 = sadd.s32 4294967294, %s3033_s23   ;;  %s3033_s23 = sphi %s3088_s23, %s26_s23   ;;  %s3029_s22 = sphi %s3086_s22, %s3930_s22   ;;  %s3025_s21 = sphi %s3084_s21, %s3929_s21   ;;  %s3021_s20 = sphi %s3082_s20, %s3928_s20   ;;  %s3017_s19 = sphi %s3080_s19, %s3927_s19   ;;  %s3013_s18 = sphi %s3078_s18, %s3926_s18  }
   0xc   : > { %p54_p0 = scmp.ne.s32.totalorder %s3021_s20, %s3017_s19  ;;  %p55_p1 = scmp.eq.s32.totalorder %s3033_s23, 0 }
   0xd   : > { %p60_p2 = scmp.ne.s32.totalorder %s3017_s19, %s3013_s18  ;;  %p3898_p3 = scmp.eq.s32.totalorder %s3109_s24, 0 }
   0xe   : > { %p128_p4 = scmp.eq.s32.totalorder %s3109_s24, 1  ;;  %p3120_p5 = por %p55_p1, %p54_p0 }
   0xf   : > { %p134_p6 = scmp.eq.s32.totalorder %s3903_s25, 1  ;;  %p3128_p7 = por %p3898_p3, %p60_p2 }
  0x10   : > { %p3132_p8 = por %p128_p4, %p54_p0  ;;  %p1986_p10 = scmp.ge.s32.totalorder %s3033_s23, 1 }
  0x11   : > { %s3906_s28 = scalar_select %p3128_p7, 1, 0 }
  0x12   : > { %s3907_s29 = scalar_select %p3132_p8, 1, 0 }
  0x13   : > { %p3136_p9 = por %p134_p6, %p60_p2  ;;  %p197_p11 = scmp.lt.s32.totalorder %s3033_s23, 3 }
  0x14   : > { %s3035_s7 = smov [#allocation5]   ;;  %p2644_p1 = scmp.lt.s32.totalorder %s3033_s23, 2 }
  0x15   : > { %s3908_s30 = scalar_select %p3136_p9, 1, 0 }
  0x16   : > { %p3143_p13 = pnand %p1986_p10, %p197_p11  ;;  %s210_s8 = sshll.u32 %s3035_s7, 4  ;;  %s211_s8 = int_to_ptr.vmem [resolvable:$true] %s210_s8 }
  0x17   : > { %p3152_p4 = pnand %p2644_p1, %p3120_p5  ;;  %s3036_s10 = smov [#allocation7]  }
  0x18   : > { %s3909_s6 = scalar_select %p3143_p13, 1, 0 }
  0x19   : > { %p2621_p0 = pneg %p3143_p13  ;;  %s220_s11 = sshll.u32 %s3036_s10, 4  ;;  %s3162_s11 = int_to_ptr.vmem [resolvable:$true] %s220_s11 }
  0x1a   : > { %s3910_s9 = scalar_select %p3152_p4, 1, 0 }
  0x1b   : > { %p3158_p2 = pnand %p2621_p0, %p3898_p3  ;;  %s3912_s1 = sld [smem:[#allocation16_spill]] }
  0x1d   : > { %p2803_p6 = pneg %p3158_p2 }
  0x21   : > { %s2801_s15 = scalar_lea.hbm %s3912_s1, 16 }
  0x22   : > { %p2802_p5 = scmp.ne.s32.totalorder %s3912_s1, %s2801_s15  ;;  %p2808_p1 = scmp.lt.u32.totalorder %s2801_s15, %s3912_s1 }
  0x24   : > { %p2804_p10 = pnand %p2803_p6, %p2802_p5 }
  0x26   : > { %p2805_p11 = pneg %p2804_p10 }
  0x28   : > { %p2810_p0 = pnand %p2808_p1, %p2805_p11 }
  0x2a   : > { %2813 = shalt.err (!%p2810_p0)
}
  0x2b   : > { %s2814_s10 = scalar_lea.vmem %s211_s8, 16  ;;  %s2821_s13 = scalar_lea.vmem %s211_s8, 32 }
  0x2c   : > { %p2815_p12 = scmp.ne.s32.totalorder %s211_s8, %s2814_s10  ;;  %p2822_p8 = scmp.lt.s32.totalorder %s211_s8, %s211_s8 }
  0x2d   : > { %p2823_p7 = scmp.lt.s32.totalorder %s2821_s13, %s2814_s10 }
  0x2e   : > { %p2817_p3 = pnand %p2815_p12, %p2803_p6 }
  0x2f   : > { %p2824_p13 = por %p2823_p7, %p2822_p8 }
  0x30   : > { %p2818_p9 = pneg %p2817_p3 }
  0x32   : > { %p2825_p4 = pnand %p2824_p13, %p2818_p9 }
  0x34   : > { %2828 = shalt.err (!%p2825_p4)
}
  0x35   : > { %2624 = dma.hbm_to_vmem [thread:$0]  (!%p3158_p2), %s3912_s1, 16, %s211_s8, [#allocation6]  }
  0x36   : > { %s2829_s27 = scalar_lea.hbm %s3894_s2, 3072 }
  0x37   : > { %p2830_p3 = scmp.ne.s32.totalorder %s3894_s2, %s2829_s27  ;;  %p2836_p9 = scmp.lt.u32.totalorder %s2829_s27, %s3894_s2 }
  0x39   : > { %p2832_p7 = pnand %p2830_p3, %p2803_p6 }
  0x3b   : > { %p2833_p8 = pneg %p2832_p7 }
  0x3d   : > { %p2838_p12 = pnand %p2836_p9, %p2833_p8 }
  0x3f   : > { %2841 = shalt.err (!%p2838_p12)
}
  0x40   : > { %s2842_s8 = scalar_lea.vmem %s3162_s11, 3072  ;;  %p2850_p10 = scmp.lt.s32.totalorder %s3162_s11, %s3162_s11 }
  0x41   : > { %p2843_p13 = scmp.ne.s32.totalorder %s3162_s11, %s2842_s8  ;;  %p2851_p11 = scmp.lt.s32.totalorder %s2842_s8, %s2842_s8 }
  0x43   : > { %p2845_p4 = pnand %p2843_p13, %p2803_p6  ;;  %p2852_p1 = por %p2851_p11, %p2850_p10 }
  0x45   : > { %p2846_p5 = pneg %p2845_p4 }
  0x47   : > { %p2853_p0 = pnand %p2852_p1, %p2846_p5 }
  0x49   : > { %2856 = shalt.err (!%p2853_p0)
}
  0x4a   : > { %s3037_s25 = smov 192   ;;  %s3038_s14 = smov 12  }
  0x4b   : > { %2627 = dma.hbm_to_vmem [thread:$0]  (!%p3158_p2), %s3894_s2, 3072, %s3162_s11, [#allocation6], %s3037_s25, %s3037_s25, %s3038_s14  }
  0x4c   : > { %s234_s17 = sand.u32 1, %s3021_s20   ;;  %s38_s27 = sadd.s32 1, %s3029_s22 }
  0x4d   : > { %s1990_s7 = sshll.u32 %s234_s17, 8  ;;  %p40_p6 = scmp.ge.s32.totalorder %s38_s27, 2 }
  0x4e   : > { %s2132_s10 = sshll.u32 %s3029_s22, 12  ;;  %s238_s13 = scalar_lea.vmem [#allocation2], %s1990_s7 }
  0x4f   : > { %s247_s8 = sshll.u32 %s238_s13, 4  ;;  %s3932_s27 = smov (%p40_p6, %s38_s27), 0  ;;  %s3221_s8 = int_to_ptr.vmem [resolvable:$true] %s247_s8 }
  0x50   : > { %s3219_s12 = scalar_lea.hbm %s3892_s0, %s2132_s10  ;;  %s42_s11 = ssub.s32 %s3029_s22, %s3932_s27 }
  0x51   : > { %p3225_p2 = scmp.eq.s32.totalorder %s42_s11, 0  ;;  %s3229_s14 = scalar_lea.sflag [#allocation3], %s234_s17 }
  0x52   : > { %s2857_s16 = scalar_lea.hbm %s3219_s12, 4096  ;;  %p3914_p7 = scmp.ne.s32.totalorder %s3910_s9, 0 }
  0x53   : > { %p2858_p3 = scmp.ne.s32.totalorder %s3219_s12, %s2857_s16  ;;  %s2862_s15 = scalar_lea.hbm %s3892_s0, 8192 }
  0x54   : > { %p2859_p8 = pneg %p3914_p7  ;;  %p2863_p13 = scmp.lt.u32.totalorder %s3219_s12, %s3892_s0 }
  0x55   : > { %p2864_p4 = scmp.lt.u32.totalorder %s2862_s15, %s2857_s16  ;;  %p2866_p10 = scmp.lt.u32.totalorder %s2857_s16, %s3219_s12 }
  0x56   : > { %p2860_p9 = pnand %p2859_p8, %p2858_p3 }
  0x57   : > { %p2865_p5 = por %p2864_p4, %p2863_p13 }
  0x58   : > { %p2861_p12 = pneg %p2860_p9 }
  0x59   : > { %p2867_p11 = por %p2866_p10, %p2865_p5 }
  0x5b   : > { %p2868_p1 = pnand %p2867_p11, %p2861_p12 }
  0x5d   : > { %2871 = shalt.err (!%p2868_p1)
}
  0x5e   : > { %s2872_s17 = scalar_lea.vmem %s3221_s8, 4096  ;;  %s3039_s13 = smov [#allocation2]  }
  0x5f   : > { %p2873_p0 = scmp.ne.s32.totalorder %s3221_s8, %s2872_s17  ;;  %s2877_s11 = sshll.u32 %s3039_s13, 4  ;;  %s2878_s11 = int_to_ptr.vmem [resolvable:$false] %s2877_s11 }
  0x60   : > { %s2879_s1 = scalar_lea.vmem %s2878_s11, 8192  ;;  %p2880_p9 = scmp.lt.s32.totalorder %s3221_s8, %s2878_s11 }
  0x61   : > { %p2875_p6 = pnand %p2873_p0, %p2859_p8  ;;  %p2881_p13 = scmp.lt.s32.totalorder %s2879_s1, %s2872_s17 }
  0x63   : > { %p2876_p3 = pneg %p2875_p6  ;;  %p2882_p4 = por %p2881_p13, %p2880_p9 }
  0x65   : > { %p2883_p5 = pnand %p2882_p4, %p2876_p3 }
  0x67   : > { %2886 = shalt.err (!%p2883_p5)
}
  0x68   : > { %s3040_s16 = smov 128   ;;  %s3041_s26 = smov 8  }
  0x69   : > { %2631 = dma.hbm_to_vmem [thread:$0]  (!%p3914_p7), %s3219_s12, 4096, %s3221_s8, %s3229_s14, %s3040_s16, %s3040_s16, %s3041_s26  }
  0x6a   : > { %s3915_s15 = sadd.s32 1, %s3021_s20  ;;  %p3916_p8 = scmp.ne.s32.totalorder %s3909_s6, 0 }
  0x6b   : > { %s3262_s7 = scalar_select %p3225_p2, %s3021_s20, %s3915_s15  }
  0x6c   : > { %259 = sbr.rel (%p3916_p8) target bundleno = 802 (0x322), region = 32  ;;  %s3267_s10 = sand.u32 (!%p3916_p8), 1, %s3017_s19  }
  0x6d   : > { %s1994_s17 = sshll.u32 (!%p3916_p8), %s3267_s10, 8  ;;  %s262_s13 = scalar_lea.sflag (!%p3916_p8), [#allocation3], %s3267_s10 }
  0x6e   : > { %s3271_s11 = scalar_lea.vmem (!%p3916_p8), [#allocation2], %s1994_s17  ;;  %p3917_p12 = scmp.ne.s32.totalorder (!%p3916_p8), %s3906_s28, 0 }
  0x73   : > { %2996 = dma.done.wait (%p3917_p12), %s262_s13, 4096  }
  0x74   : > { %2998 = vsyncadd (%p3917_p12), %s262_s13, 4294963200  ;;  %p3918_p2 = scmp.eq.s32.totalorder %s3109_s24, 0 }
  0x76   : > { %3000 = dma.done.wait (%p3918_p2), [#allocation6], 3088   ;;  %p3919_p7 = pmov %p3918_p2 }
  0x77   : > { %v3282_v0 = vld [vmem:[%s3271_s11] sm:$0xff]  ;;  %v3290_v2 = vld [vmem:[%s3271_s11 + $0x8] sm:$0xff]  ;;  %v3298_v4 = vld [vmem:[%s3271_s11 + $0x10] sm:$0xff]  ;;  %s3688_s28 = sshll.u32 %s3267_s10, 7  ;;  %s3743_s25 = sshll.u32 %s3025_s21, 11 }
  0x78   : > { %3002 = vsyncadd (%p3919_p7), [#allocation6], 4294964208  ;;  %v3285_v1 = vld [vmem:[%s3271_s11 + $0xc0] sm:$0xff]  ;;  %348 = vadd.xlane.f32.xlu0 %v3282_v0  ;;  %v3293_v3 = vld [vmem:[%s3271_s11 + $0xc8] sm:$0xff]  ;;  %s3691_s6 = scalar_lea.vmem [#allocation8], %s3688_s28  ;;  %s3695_s9 = scalar_lea.vmem [#allocation9], %s3688_s28 }
  0x79   : > { %396 = vadd.xlane.f32.xlu1 %v3285_v1  ;;  %v3301_v5 = vld [vmem:[%s3271_s11 + $0x18] sm:$0xff]  ;;  %v3306_v6 = vld [vmem:[%s3271_s11 + $0xd0] sm:$0xff]  ;;  %v3312_v8 = vld [vmem:[%s3271_s11 + $0x20] sm:$0xff]  ;;  %s3715_s8 = scalar_lea.vmem [#allocation11], %s3688_s28  ;;  %s1775_s14 = sshll.u32 %s3691_s6, 4  ;;  %s3755_s14 = int_to_ptr.vmem [resolvable:$true] %s1775_s14 }
  0x7a   : > { %v3309_v7 = vld [vmem:[%s3271_s11 + $0xd8] sm:$0xff]  ;;  %v3315_v9 = vld [vmem:[%s3271_s11 + $0x28] sm:$0xff]  ;;  %v3320_v10 = vld [vmem:[%s3271_s11 + $0xe0] sm:$0xff]  ;;  %s1793_s1 = sshll.u32 %s3695_s9, 4  ;;  %s3753_s26 = scalar_lea.hbm %s3895_s3, %s3743_s25  ;;  %s3765_s1 = int_to_ptr.vmem [resolvable:$true] %s1793_s1 }
  0x7b   : > { %v3323_v11 = vld [vmem:[%s3271_s11 + $0xe8] sm:$0xff]  ;;  %v3330_v12 = vld [vmem:[%s3271_s11 + $0x30] sm:$0xff]  ;;  %v3333_v13 = vld [vmem:[%s3271_s11 + $0x38] sm:$0xff]  ;;  %s3763_s13 = scalar_lea.hbm %s3896_s4, %s3743_s25  ;;  %s1750_s28 = scalar_lea.sflag [#allocation4], %s3267_s10 }
  0x7c   : > { %350 = vadd.xlane.f32.xlu0 %v3290_v2  ;;  %v3338_v14 = vld [vmem:[%s3271_s11 + $0xf0] sm:$0xff]  ;;  %v3341_v15 = vld [vmem:[%s3271_s11 + $0xf8] sm:$0xff]  ;;  %v3346_v16 = vld [vmem:[%s3271_s11 + $0x40] sm:$0xff]  ;;  %s2887_s16 = scalar_lea.vmem %s3755_s14, 2048  ;;  %p3920_p11 = scmp.ne.s32.totalorder %s3907_s29, 0 }
  0x7d   : > { %398 = vadd.xlane.f32.xlu1 %v3293_v3  ;;  %v3349_v17 = vld [vmem:[%s3271_s11 + $0x48] sm:$0xff]  ;;  %v3354_v18 = vld [vmem:[%s3271_s11 + $0x50] sm:$0xff]  ;;  %v3357_v19 = vld [vmem:[%s3271_s11 + $0x58] sm:$0xff]  ;;  %p2888_p10 = scmp.ne.s32.totalorder %s3755_s14, %s2887_s16  ;;  %s3043_s21 = smov [#allocation8]  }
  0x7e   : > { %v3362_v20 = vld [vmem:[%s3271_s11 + $0x60] sm:$0xff]  ;;  %v3365_v21 = vld [vmem:[%s3271_s11 + $0x68] sm:$0xff]  ;;  %v3370_v22 = vld [vmem:[%s3271_s11 + $0x70] sm:$0xff]  ;;  %s2891_s12 = sshll.u32 %s3043_s21, 4  ;;  %s2892_s12 = int_to_ptr.vmem [resolvable:$false] %s2891_s12 }
  0x7f   : > { %v3373_v23 = vld [vmem:[%s3271_s11 + $0x78] sm:$0xff]  ;;  %v3378_v24 = vld [vmem:[%s3271_s11 + $0x80] sm:$0xff]  ;;  %v3381_v25 = vld [vmem:[%s3271_s11 + $0x88] sm:$0xff]  ;;  %p2889_p1 = pnand %p2888_p10, %p3920_p11  ;;  %s2893_s15 = scalar_lea.vmem %s2892_s12, 4096 }
  0x80   : > { %352 = vadd.xlane.f32.xlu0 %v3298_v4  ;;  %v3386_v26 = vld [vmem:[%s3271_s11 + $0x90] sm:$0xff]  ;;  %v3389_v27 = vld [vmem:[%s3271_s11 + $0x98] sm:$0xff]  ;;  %v3394_v28 = vld [vmem:[%s3271_s11 + $0xa0] sm:$0xff]  ;;  %p2894_p6 = scmp.lt.s32.totalorder %s3755_s14, %s2892_s12  ;;  %p2895_p3 = scmp.lt.s32.totalorder %s2893_s15, %s2887_s16 }
  0x81   : > { %354 = vadd.xlane.f32.xlu1 %v3301_v5  ;;  %v3397_v29 = vld [vmem:[%s3271_s11 + $0xa8] sm:$0xff]  ;;  %v3402_v30 = vld [vmem:[%s3271_s11 + $0xb0] sm:$0xff]  ;;  %v3405_v31 = vld [vmem:[%s3271_s11 + $0xb8] sm:$0xff]  ;;  %p2890_p0 = pneg %p2889_p1 }
  0x82   : > { %v2705_v32 = vld [vmem:[#allocation7 + $0x4] ss:$12 sps:$4 sm:$0xff]   ;;  %v2707_v33 = vld [vmem:[#allocation7] ss:$12 sps:$4 sm:$0xff]   ;;  %v2708_v34 = vld [vmem:[#allocation7 + $0x1c] ss:$12 sps:$4 sm:$0xff]   ;;  %p2896_p9 = por %p2895_p3, %p2894_p6 }
  0x83   : > { %915 = vmatprep.subr.bf16.mxu0 %v2705_v32  ;;  %2589 = vmatprep.subr.bf16.mxu1 %v2705_v32  ;;  %v2710_v35 = vld [vmem:[#allocation7 + $0x18] ss:$12 sps:$4 sm:$0xff]  }
  0x84   : > { %400 = vadd.xlane.f32.xlu0 %v3306_v6  ;;  %916 = vmatpush1.bf16.msra.mxu0 %v2707_v33  ;;  %p2897_p13 = pnand %p2896_p9, %p2890_p0 }
  0x85   : > { %402 = vadd.xlane.f32.xlu1 %v3309_v7  ;;  %2597 = vmatpush1.bf16.msra.mxu1 %v2707_v33 }
  0x86   : > { %917 = vmatprep.subr.bf16.mxu0 %v2708_v34  ;;  %2590 = vmatprep.subr.bf16.mxu1 %v2708_v34 }
  0x88   : > { %356 = vadd.xlane.f32.xlu0 %v3312_v8  ;;  %918 = vmatpush1.bf16.msra.mxu0 %v2710_v35 }
  0x89   : > { %358 = vadd.xlane.f32.xlu1 %v3315_v9  ;;  %2598 = vmatpush1.bf16.msra.mxu1 %v2710_v35 }
  0x8c   : > { %404 = vadd.xlane.f32.xlu0 %v3320_v10 }
  0x8d   : > { %406 = vadd.xlane.f32.xlu1 %v3323_v11 }
  0x90   : > { %360 = vadd.xlane.f32.xlu0 %v3330_v12 }
  0x91   : > { %362 = vadd.xlane.f32.xlu1 %v3333_v13 }
  0x94   : > { %408 = vadd.xlane.f32.xlu0 %v3338_v14 }
  0x95   : > { %410 = vadd.xlane.f32.xlu1 %v3341_v15 }
  0x98   : > { %364 = vadd.xlane.f32.xlu0 %v3346_v16 }
  0x99   : > { %366 = vadd.xlane.f32.xlu1 %v3349_v17 }
  0x9c   : > { %368 = vadd.xlane.f32.xlu0 %v3354_v18 }
  0x9d   : > { %370 = vadd.xlane.f32.xlu1 %v3357_v19 }
  0xa0   : > { %372 = vadd.xlane.f32.xlu0 %v3362_v20 }
  0xa1   : > { %374 = vadd.xlane.f32.xlu1 %v3365_v21 }
  0xa4   : > { %376 = vadd.xlane.f32.xlu0 %v3370_v22 }
  0xa5   : > { %378 = vadd.xlane.f32.xlu1 %v3373_v23 }
  0xa8   : > { %380 = vadd.xlane.f32.xlu0 %v3378_v24 }
  0xa9   : > { %382 = vadd.xlane.f32.xlu1 %v3381_v25 }
  0xac   : > { %384 = vadd.xlane.f32.xlu0 %v3386_v26 }
  0xad   : > { %386 = vadd.xlane.f32.xlu1 %v3389_v27 }
  0xb0   : > { %388 = vadd.xlane.f32.xlu0 %v3394_v28 }
  0xb1   : > { %390 = vadd.xlane.f32.xlu1 %v3397_v29 }
  0xb4   : > { %392 = vadd.xlane.f32.xlu0 %v3402_v30 }
  0xb5   : > { %394 = vadd.xlane.f32.xlu1 %v3405_v31 }
 0x105   : > { %v349_v36 = vpop.xlane.xlu0 %348 }
 0x106   : > { %v397_v37 = vpop.xlane.xlu1 %396  ;;  %v413_v38 = vmul.f32 0.0078125, %v349_v36  ;;  %v2711_v36 = vld [vmem:[#allocation7 + $0x34] ss:$12 sps:$4 sm:$0xff]  }
 0x107   : > { %v437_v39 = vmul.f32 0.0078125, %v397_v37  ;;  %919 = vmatprep.subr.bf16.mxu0 %v2711_v36  ;;  %2591 = vmatprep.subr.bf16.mxu1 %v2711_v36 }
 0x108   : > { %v3410_v40 = vsub.f32 %v3282_v0, %v413_v38 }
 0x109   : > { %v3413_v41 = vsub.f32 %v3285_v1, %v437_v39  ;;  %v351_v42 = vpop.xlane.xlu0 %350 }
 0x10a   : > { %v399_v43 = vpop.xlane.xlu1 %398  ;;  %v414_v44 = vmul.f32 0.0078125, %v351_v42  ;;  %v477_v45 = vmul.f32 %v3410_v40, %v3410_v40  ;;  %v2713_v42 = vld [vmem:[#allocation7 + $0x30] ss:$12 sps:$4 sm:$0xff]  }
 0x10b   : > { %v438_v46 = vmul.f32 0.0078125, %v399_v43  ;;  %v501_v49 = vmul.f32 %v3413_v41, %v3413_v41  ;;  %920 = vmatpush1.bf16.msra.mxu0 %v2713_v42  ;;  %2599 = vmatpush1.bf16.msra.mxu1 %v2713_v42 }
 0x10c   : > { %v3418_v47 = vsub.f32 %v3290_v2, %v414_v44  ;;  %509 = vadd.xlane.f32.xlu0 %v477_v45 }
 0x10d   : > { %v3421_v48 = vsub.f32 %v3293_v3, %v438_v46  ;;  %v353_v50 = vpop.xlane.xlu0 %352 }
 0x10e   : > { %v355_v51 = vpop.xlane.xlu1 %354  ;;  %v415_v52 = vmul.f32 0.0078125, %v353_v50  ;;  %v478_v53 = vmul.f32 %v3418_v47, %v3418_v47 }
 0x10f   : > { %v416_v54 = vmul.f32 0.0078125, %v355_v51  ;;  %v502_v57 = vmul.f32 %v3421_v48, %v3421_v48  ;;  %v2714_v51 = vld [vmem:[#allocation7 + $0x4c] ss:$12 sps:$4 sm:$0xff]  }
 0x110   : > { %v3428_v55 = vsub.f32 %v3298_v4, %v415_v52  ;;  %557 = vadd.xlane.f32.xlu0 %v501_v49  ;;  %511 = vadd.xlane.f32.xlu1 %v478_v53 }
 0x111   : > { %v3431_v56 = vsub.f32 %v3301_v5, %v416_v54  ;;  %v401_v58 = vpop.xlane.xlu0 %400  ;;  %921 = vmatprep.subr.bf16.mxu0 %v2714_v51  ;;  %2592 = vmatprep.subr.bf16.mxu1 %v2714_v51 }
 0x112   : > { %v403_v59 = vpop.xlane.xlu1 %402  ;;  %v439_v60 = vmul.f32 0.0078125, %v401_v58  ;;  %v479_v61 = vmul.f32 %v3428_v55, %v3428_v55 }
 0x113   : > { %v440_v62 = vmul.f32 0.0078125, %v403_v59  ;;  %v480_v1 = vmul.f32 %v3431_v56, %v3431_v56 }
 0x114   : > { %v3438_v63 = vsub.f32 %v3306_v6, %v439_v60  ;;  %559 = vadd.xlane.f32.xlu1 %v502_v57  ;;  %513 = vadd.xlane.f32.xlu0 %v479_v61  ;;  %v2719_v61 = vld [vmem:[#allocation7 + $0x60] ss:$12 sps:$4 sm:$0xff]  }
 0x115   : > { %v3441_v0 = vsub.f32 %v3309_v7, %v440_v62  ;;  %v357_v2 = vpop.xlane.xlu0 %356 }
 0x116   : > { %v359_v3 = vpop.xlane.xlu1 %358  ;;  %v417_v4 = vmul.f32 0.0078125, %v357_v2  ;;  %v503_v5 = vmul.f32 %v3438_v63, %v3438_v63 }
 0x117   : > { %v418_v32 = vmul.f32 0.0078125, %v359_v3  ;;  %v504_v7 = vmul.f32 %v3441_v0, %v3441_v0 }
 0x118   : > { %v3448_v33 = vsub.f32 %v3312_v8, %v417_v4  ;;  %515 = vadd.xlane.f32.xlu1 %v480_v1  ;;  %561 = vadd.xlane.f32.xlu0 %v503_v5 }
 0x119   : > { %v3451_v6 = vsub.f32 %v3315_v9, %v418_v32  ;;  %v405_v34 = vpop.xlane.xlu0 %404 }
 0x11a   : > { %v407_v35 = vpop.xlane.xlu1 %406  ;;  %v441_v37 = vmul.f32 0.0078125, %v405_v34  ;;  %v481_v38 = vmul.f32 %v3448_v33, %v3448_v33 }
 0x11b   : > { %v442_v39 = vmul.f32 0.0078125, %v407_v35  ;;  %v482_v43 = vmul.f32 %v3451_v6, %v3451_v6 }
 0x11c   : > { %v3458_v8 = vsub.f32 %v3320_v10, %v441_v37  ;;  %563 = vadd.xlane.f32.xlu1 %v504_v7  ;;  %517 = vadd.xlane.f32.xlu0 %v481_v38  ;;  %v2716_v10 = vld [vmem:[#allocation7 + $0x48] ss:$12 sps:$4 sm:$0xff]   ;;  %v2722_v7 = vld [vmem:[#allocation7 + $0x78] ss:$12 sps:$4 sm:$0xff]  }
 0x11d   : > { %v3461_v9 = vsub.f32 %v3323_v11, %v442_v39  ;;  %v361_v44 = vpop.xlane.xlu0 %360  ;;  %922 = vmatpush1.bf16.msra.mxu0 %v2716_v10  ;;  %2600 = vmatpush1.bf16.msra.mxu1 %v2716_v10 }
 0x11e   : > { %v363_v45 = vpop.xlane.xlu1 %362  ;;  %v419_v46 = vmul.f32 0.0078125, %v361_v44  ;;  %v505_v49 = vmul.f32 %v3458_v8, %v3458_v8 }
 0x11f   : > { %v420_v50 = vmul.f32 0.0078125, %v363_v45  ;;  %v506_v53 = vmul.f32 %v3461_v9, %v3461_v9 }
 0x120   : > { %v3468_v52 = vsub.f32 %v3330_v12, %v419_v46  ;;  %519 = vadd.xlane.f32.xlu1 %v482_v43  ;;  %565 = vadd.xlane.f32.xlu0 %v505_v49  ;;  %v2717_v12 = vld [vmem:[#allocation7 + $0x64] ss:$12 sps:$4 sm:$0xff]  }
 0x121   : > { %v3471_v11 = vsub.f32 %v3333_v13, %v420_v50  ;;  %v409_v54 = vpop.xlane.xlu0 %408  ;;  %923 = vmatprep.subr.bf16.mxu0 %v2717_v12  ;;  %2593 = vmatprep.subr.bf16.mxu1 %v2717_v12  ;;  %v2725_v43 = vld [vmem:[#allocation7 + $0x90] ss:$12 sps:$4 sm:$0xff]  }
 0x122   : > { %v411_v57 = vpop.xlane.xlu1 %410  ;;  %v443_v58 = vmul.f32 0.0078125, %v409_v54  ;;  %v483_v59 = vmul.f32 %v3468_v52, %v3468_v52  ;;  %924 = vmatpush1.bf16.msra.mxu0 %v2719_v61  ;;  %2601 = vmatpush1.bf16.msra.mxu1 %v2719_v61 }
 0x123   : > { %v444_v60 = vmul.f32 0.0078125, %v411_v57  ;;  %v484_v1 = vmul.f32 %v3471_v11, %v3471_v11 }
 0x124   : > { %v3478_v62 = vsub.f32 %v3338_v14, %v443_v58  ;;  %567 = vadd.xlane.f32.xlu1 %v506_v53  ;;  %521 = vadd.xlane.f32.xlu0 %v483_v59  ;;  %v2720_v14 = vld [vmem:[#allocation7 + $0x7c] ss:$12 sps:$4 sm:$0xff]  }
 0x125   : > { %v3481_v13 = vsub.f32 %v3341_v15, %v444_v60  ;;  %v365_v2 = vpop.xlane.xlu0 %364  ;;  %925 = vmatprep.subr.bf16.mxu0 %v2720_v14  ;;  %2594 = vmatprep.subr.bf16.mxu1 %v2720_v14  ;;  %v2728_v53 = vld [vmem:[#allocation7 + $0xa8] ss:$12 sps:$4 sm:$0xff]  }
 0x126   : > { %v367_v3 = vpop.xlane.xlu1 %366  ;;  %v421_v4 = vmul.f32 0.0078125, %v365_v2  ;;  %v507_v5 = vmul.f32 %v3478_v62, %v3478_v62  ;;  %926 = vmatpush1.bf16.msra.mxu0 %v2722_v7  ;;  %2602 = vmatpush1.bf16.msra.mxu1 %v2722_v7  ;;  %v3529_v14 = vld [vmem:[#allocation7 + $0x8] ss:$12 sps:$4 sm:$0xff]  }
 0x127   : > { %v422_v32 = vmul.f32 0.0078125, %v367_v3  ;;  %v508_v35 = vmul.f32 %v3481_v13, %v3481_v13 }
 0x128   : > { %v3488_v34 = vsub.f32 %v3346_v16, %v421_v4  ;;  %523 = vadd.xlane.f32.xlu1 %v484_v1  ;;  %569 = vadd.xlane.f32.xlu0 %v507_v5  ;;  %v2723_v16 = vld [vmem:[#allocation7 + $0x94] ss:$12 sps:$4 sm:$0xff]   ;;  %v3042_v4 = vmov 0  }
 0x129   : > { %v3491_v15 = vsub.f32 %v3349_v17, %v422_v32  ;;  %v369_v36 = vpop.xlane.xlu0 %368  ;;  %927 = vmatprep.subr.bf16.mxu0 %v2723_v16  ;;  %2595 = vmatprep.subr.bf16.mxu1 %v2723_v16 }
 0x12a   : > { %v371_v37 = vpop.xlane.xlu1 %370  ;;  %v423_v38 = vmul.f32 0.0078125, %v369_v36  ;;  %v485_v39 = vmul.f32 %v3488_v34, %v3488_v34  ;;  %928 = vmatpush1.bf16.msra.mxu0 %v2725_v43  ;;  %2603 = vmatpush1.bf16.msra.mxu1 %v2725_v43 }
 0x12b   : > { %v424_v42 = vmul.f32 0.0078125, %v371_v37  ;;  %v486_v45 = vmul.f32 %v3491_v15, %v3491_v15  ;;  %947 = vmatprep.mubr.bf16.mxu0 %v3042_v4  ;;  %1067 = vmatprep.mubr.bf16.mxu1 %v3042_v4 }
 0x12c   : > { %v3498_v44 = vsub.f32 %v3354_v18, %v423_v38  ;;  %571 = vadd.xlane.f32.xlu1 %v508_v35  ;;  %525 = vadd.xlane.f32.xlu0 %v485_v39  ;;  %v2726_v18 = vld [vmem:[#allocation7 + $0xac] ss:$12 sps:$4 sm:$0xff]  }
 0x12d   : > { %v3501_v17 = vsub.f32 %v3357_v19, %v424_v42  ;;  %v373_v46 = vpop.xlane.xlu0 %372  ;;  %929 = vmatprep.subr.bf16.mxu0 %v2726_v18  ;;  %2596 = vmatprep.subr.bf16.mxu1 %v2726_v18 }
 0x12e   : > { %v375_v49 = vpop.xlane.xlu1 %374  ;;  %v425_v50 = vmul.f32 0.0078125, %v373_v46  ;;  %v487_v51 = vmul.f32 %v3498_v44, %v3498_v44  ;;  %930 = vmatpush1.bf16.msra.mxu0 %v2728_v53  ;;  %2604 = vmatpush1.bf16.msra.mxu1 %v2728_v53 }
 0x12f   : > { %v426_v10 = vmul.f32 0.0078125, %v375_v49  ;;  %v488_v57 = vmul.f32 %v3501_v17, %v3501_v17  ;;  %2541 = vmatprep.subr.bf16.mxu1 %v3529_v14 }
 0x130   : > { %v3508_v54 = vsub.f32 %v3362_v20, %v425_v50  ;;  %527 = vadd.xlane.f32.xlu1 %v486_v45  ;;  %529 = vadd.xlane.f32.xlu0 %v487_v51 }
 0x131   : > { %v3511_v19 = vsub.f32 %v3365_v21, %v426_v10  ;;  %v377_v58 = vpop.xlane.xlu0 %376 }
 0x132   : > { %v379_v59 = vpop.xlane.xlu1 %378  ;;  %v427_v60 = vmul.f32 0.0078125, %v377_v58  ;;  %v489_v12 = vmul.f32 %v3508_v54, %v3508_v54 }
 0x133   : > { %v428_v61 = vmul.f32 0.0078125, %v379_v59  ;;  %v490_v1 = vmul.f32 %v3511_v19, %v3511_v19 }
 0x134   : > { %v3518_v20 = vsub.f32 %v3370_v22, %v427_v60  ;;  %531 = vadd.xlane.f32.xlu1 %v488_v57  ;;  %533 = vadd.xlane.f32.xlu0 %v489_v12 }
 0x135   : > { %v3521_v21 = vsub.f32 %v3373_v23, %v428_v61  ;;  %v381_v2 = vpop.xlane.xlu0 %380 }
 0x136   : > { %v383_v3 = vpop.xlane.xlu1 %382  ;;  %v429_v5 = vmul.f32 0.0078125, %v381_v2  ;;  %v491_v22 = vmul.f32 %v3518_v20, %v3518_v20 }
 0x137   : > { %v430_v32 = vmul.f32 0.0078125, %v383_v3  ;;  %v492_v35 = vmul.f32 %v3521_v21, %v3521_v21 }
 0x138   : > { %v3532_v23 = vsub.f32 %v3378_v24, %v429_v5  ;;  %535 = vadd.xlane.f32.xlu1 %v490_v1  ;;  %537 = vadd.xlane.f32.xlu0 %v491_v22 }
 0x139   : > { %v3535_v7 = vsub.f32 %v3381_v25, %v430_v32  ;;  %v385_v36 = vpop.xlane.xlu0 %384 }
 0x13a   : > { %v387_v37 = vpop.xlane.xlu1 %386  ;;  %v431_v38 = vmul.f32 0.0078125, %v385_v36  ;;  %v493_v39 = vmul.f32 %v3532_v23, %v3532_v23 }
 0x13b   : > { %v432_v42 = vmul.f32 0.0078125, %v387_v37  ;;  %v494_v16 = vmul.f32 %v3535_v7, %v3535_v7 }
 0x13c   : > { %v3543_v24 = vsub.f32 %v3386_v26, %v431_v38  ;;  %539 = vadd.xlane.f32.xlu1 %v492_v35  ;;  %541 = vadd.xlane.f32.xlu0 %v493_v39 }
 0x13d   : > { %v3546_v25 = vsub.f32 %v3389_v27, %v432_v42  ;;  %v389_v43 = vpop.xlane.xlu0 %388 }
 0x13e   : > { %v391_v45 = vpop.xlane.xlu1 %390  ;;  %v433_v46 = vmul.f32 0.0078125, %v389_v43  ;;  %v495_v49 = vmul.f32 %v3543_v24, %v3543_v24 }
 0x13f   : > { %v434_v50 = vmul.f32 0.0078125, %v391_v45  ;;  %v496_v27 = vmul.f32 %v3546_v25, %v3546_v25 }
 0x140   : > { %v3553_v51 = vsub.f32 %v3394_v28, %v433_v46  ;;  %543 = vadd.xlane.f32.xlu1 %v494_v16  ;;  %545 = vadd.xlane.f32.xlu0 %v495_v49 }
 0x141   : > { %v3556_v26 = vsub.f32 %v3397_v29, %v434_v50  ;;  %v393_v10 = vpop.xlane.xlu0 %392 }
 0x142   : > { %v395_v18 = vpop.xlane.xlu1 %394  ;;  %v435_v53 = vmul.f32 0.0078125, %v393_v10  ;;  %v497_v57 = vmul.f32 %v3553_v51, %v3553_v51 }
 0x143   : > { %v436_v58 = vmul.f32 0.0078125, %v395_v18  ;;  %v498_v29 = vmul.f32 %v3556_v26, %v3556_v26 }
 0x144   : > { %v3563_v59 = vsub.f32 %v3402_v30, %v435_v53  ;;  %547 = vadd.xlane.f32.xlu1 %v496_v27  ;;  %549 = vadd.xlane.f32.xlu0 %v497_v57 }
 0x145   : > { %v3566_v28 = vsub.f32 %v3405_v31, %v436_v58 }
 0x146   : > { %v499_v60 = vmul.f32 %v3563_v59, %v3563_v59 }
 0x147   : > { %v500_v12 = vmul.f32 %v3566_v28, %v3566_v28 }
 0x148   : > { %551 = vadd.xlane.f32.xlu1 %v498_v29  ;;  %553 = vadd.xlane.f32.xlu0 %v499_v60 }
 0x14c   : > { %555 = vadd.xlane.f32.xlu1 %v500_v12 }
 0x199   : > { %v510_v61 = vpop.xlane.xlu0 %509 }
 0x19a   : > { %v573_v30 = vmul.f32 0.0078125, %v510_v61  ;;  %v3575_v61 = vld [vmem:[#allocation5] ss:$0 sm:$0xff] }
 0x19c   : > { %v605_v1 = vadd.f32 1e-05, %v573_v30 }
 0x19d   : > { %v512_v2 = vpop.xlane.xlu1 %511  ;;  %v558_v3 = vpop.xlane.xlu0 %557 }
 0x19e   : > { %2737 = vrsqrt.f32 %v605_v1  ;;  %v574_v31 = vmul.f32 0.0078125, %v512_v2  ;;  %v597_v5 = vmul.f32 0.0078125, %v558_v3 }
 0x1a0   : > { %v606_v22 = vadd.f32 1e-05, %v574_v31  ;;  %v629_v32 = vadd.f32 1e-05, %v597_v5 }
 0x1a1   : > { %v560_v35 = vpop.xlane.xlu1 %559  ;;  %v514_v36 = vpop.xlane.xlu0 %513 }
 0x1a2   : > { %2739 = vrsqrt.f32 %v606_v22  ;;  %v598_v37 = vmul.f32 0.0078125, %v560_v35  ;;  %v575_v38 = vmul.f32 0.0078125, %v514_v36 }
 0x1a3   : > { %2741 = vrsqrt.f32 %v629_v32 }
 0x1a4   : > { %v630_v39 = vadd.f32 1e-05, %v598_v37  ;;  %v607_v42 = vadd.f32 1e-05, %v575_v38 }
 0x1a5   : > { %v516_v16 = vpop.xlane.xlu1 %515  ;;  %v562_v43 = vpop.xlane.xlu0 %561 }
 0x1a6   : > { %2743 = vrsqrt.f32 %v630_v39  ;;  %v576_v45 = vmul.f32 0.0078125, %v516_v16  ;;  %v599_v46 = vmul.f32 0.0078125, %v562_v43 }
 0x1a7   : > { %2745 = vrsqrt.f32 %v607_v42 }
 0x1a8   : > { %v2738_v49 = vpop.eup %2737  ;;  %v608_v50 = vadd.f32 1e-05, %v576_v45  ;;  %v631_v27 = vadd.f32 1e-05, %v599_v46 }
 0x1a9   : > { %v564_v10 = vpop.xlane.xlu1 %563  ;;  %v518_v18 = vpop.xlane.xlu0 %517  ;;  %v669_v58 = vmul.f32 %v2738_v49, %v3410_v40 }
 0x1aa   : > { %2747 = vrsqrt.f32 %v608_v50  ;;  %v600_v53 = vmul.f32 0.0078125, %v564_v10  ;;  %v577_v57 = vmul.f32 0.0078125, %v518_v18 }
 0x1ab   : > { %2749 = vrsqrt.f32 %v631_v27  ;;  %v707_v22 = vmul.f32 %v3575_v61, %v669_v58  ;;  %v2730_v58 = vld [vmem:[#allocation7 + $0x20] ss:$12 sps:$4 sm:$0xff]  }
 0x1ac   : > { %v2740_v29 = vpop.eup %2739  ;;  %v632_v60 = vadd.f32 1e-05, %v600_v53  ;;  %v609_v12 = vadd.f32 1e-05, %v577_v57 }
 0x1ad   : > { %v2742_v30 = vpop.eup %2741  ;;  %v520_v1 = vpop.xlane.xlu1 %519  ;;  %v670_v3 = vmul.f32 %v2740_v29, %v3418_v47 }
 0x1ae   : > { %v566_v2 = vpop.xlane.xlu0 %565  ;;  %2751 = vrsqrt.f32 %v632_v60  ;;  %v578_v31 = vmul.f32 0.0078125, %v520_v1  ;;  %v693_v40 = vmul.f32 %v2742_v30, %v3413_v41 }
 0x1af   : > { %v601_v5 = vmul.f32 0.0078125, %v566_v2  ;;  %2753 = vrsqrt.f32 %v609_v12  ;;  %v708_v32 = vmul.f32 %v3575_v61, %v670_v3 }
 0x1b0   : > { %v2744_v35 = vpop.eup %2743  ;;  %v610_v36 = vadd.f32 1e-05, %v578_v31  ;;  %v731_v46 = vmul.f32 %v3575_v61, %v693_v40  ;;  %v2731_v40 = vld [vmem:[#allocation7 + $0x38] ss:$12 sps:$4 sm:$0xff]  }
 0x1b1   : > { %v633_v37 = vadd.f32 1e-05, %v601_v5  ;;  %v2746_v38 = vpop.eup %2745  ;;  %v568_v39 = vpop.xlane.xlu1 %567  ;;  %v3581_v16 = vpack.c.bf16 %v708_v32, %v707_v22  ;;  %v694_v47 = vmul.f32 %v2744_v35, %v3421_v48 }
 0x1b2   : > { %v522_v42 = vpop.xlane.xlu0 %521  ;;  %2755 = vrsqrt.f32 %v610_v36  ;;  %v602_v43 = vmul.f32 0.0078125, %v568_v39  ;;  %v671_v49 = vmul.f32 %v2746_v38, %v3428_v55 }
 0x1b3   : > { %v579_v45 = vmul.f32 0.0078125, %v522_v42  ;;  %2757 = vrsqrt.f32 %v633_v37  ;;  %948 = vmatmul.mubr.bf16.vlgmr.msra.gmra.mrb[0].mxu0 %v3581_v16  ;;  %v732_v41 = vmul.f32 %v3575_v61, %v694_v47 }
 0x1b4   : > { %v2748_v50 = vpop.eup %2747  ;;  %v634_v27 = vadd.f32 1e-05, %v602_v43  ;;  %957 = vmatprep.mubr.bf16.mxu0 %v3042_v4  ;;  %v709_v55 = vmul.f32 %v3575_v61, %v671_v49 }
 0x1b5   : > { %v611_v10 = vadd.f32 1e-05, %v579_v45  ;;  %v2750_v18 = vpop.eup %2749  ;;  %v524_v53 = vpop.xlane.xlu1 %523  ;;  %v3589_v57 = vpack.c.bf16 %v732_v41, %v731_v46  ;;  %v672_v29 = vmul.f32 %v2748_v50, %v3431_v56  ;;  %v2732_v41 = vld [vmem:[#allocation7 + $0x50] ss:$12 sps:$4 sm:$0xff]  }
 0x1b6   : > { %v570_v48 = vpop.xlane.xlu0 %569  ;;  %2759 = vrsqrt.f32 %v634_v27  ;;  %v580_v60 = vmul.f32 0.0078125, %v524_v53  ;;  %v695_v1 = vmul.f32 %v2750_v18, %v3438_v63 }
 0x1b7   : > { %v603_v12 = vmul.f32 0.0078125, %v570_v48  ;;  %2761 = vrsqrt.f32 %v611_v10  ;;  %1068 = vmatmul.mubr.bf16.vlgmr.msra.gmra.mrb[0].mxu1 %v3589_v57  ;;  %v710_v30 = vmul.f32 %v3575_v61, %v672_v29 }
 0x1b8   : > { %v2752_v2 = vpop.eup %2751  ;;  %v612_v3 = vadd.f32 1e-05, %v580_v60  ;;  %2542 = vmatpush3.bf16.msra.mxu1 %v3529_v14  ;;  %1077 = vmatprep.mubr.bf16.mxu1 %v3042_v4  ;;  %v733_v63 = vmul.f32 %v3575_v61, %v695_v1 }
 0x1b9   : > { %v635_v31 = vadd.f32 1e-05, %v603_v12  ;;  %v2754_v56 = vpop.eup %2753  ;;  %v572_v5 = vpop.xlane.xlu1 %571  ;;  %2543 = vmatprep.subr.bf16.mxu1 %v2730_v58  ;;  %v3598_v32 = vpack.c.bf16 %v710_v30, %v709_v55  ;;  %v696_v35 = vmul.f32 %v2752_v2, %v3441_v0  ;;  %v2733_v55 = vld [vmem:[#allocation7 + $0x68] ss:$12 sps:$4 sm:$0xff]  }
 0x1ba   : > { %v526_v22 = vpop.xlane.xlu0 %525  ;;  %2763 = vrsqrt.f32 %v612_v3  ;;  %v604_v36 = vmul.f32 0.0078125, %v572_v5  ;;  %v673_v38 = vmul.f32 %v2754_v56, %v3448_v33 }
 0x1bb   : > { %v581_v37 = vmul.f32 0.0078125, %v526_v22  ;;  %2765 = vrsqrt.f32 %v635_v31  ;;  %958 = vmatmul.mubr.bf16.gmra.mrb[4].mxu0 %v3598_v32  ;;  %v734_v14 = vmul.f32 %v3575_v61, %v696_v35 }
 0x1bc   : > { %v2756_v39 = vpop.eup %2755  ;;  %v636_v42 = vadd.f32 1e-05, %v604_v36  ;;  %2544 = vmatpush3.bf16.msra.mxu1 %v2730_v58  ;;  %967 = vmatprep.mubr.bf16.mxu0 %v3042_v4  ;;  %v711_v33 = vmul.f32 %v3575_v61, %v673_v38 }
 0x1bd   : > { %v613_v47 = vadd.f32 1e-05, %v581_v37  ;;  %v2758_v43 = vpop.eup %2757  ;;  %v528_v0 = vpop.xlane.xlu1 %527  ;;  %2545 = vmatprep.subr.bf16.mxu1 %v2731_v40  ;;  %v3606_v46 = vpack.c.bf16 %v734_v14, %v733_v63  ;;  %v674_v49 = vmul.f32 %v2756_v39, %v3451_v6 }
 0x1be   : > { %v530_v45 = vpop.xlane.xlu0 %529  ;;  %2767 = vrsqrt.f32 %v636_v42  ;;  %v582_v50 = vmul.f32 0.0078125, %v528_v0  ;;  %v697_v18 = vmul.f32 %v2758_v43, %v3458_v8  ;;  %v2735_v0 = vld [vmem:[#allocation7 + $0x98] ss:$12 sps:$4 sm:$0xff]  }
 0x1bf   : > { %v583_v27 = vmul.f32 0.0078125, %v530_v45  ;;  %2769 = vrsqrt.f32 %v613_v47  ;;  %1078 = vmatmul.mubr.bf16.gmra.mrb[4].mxu1 %v3606_v46  ;;  %v712_v10 = vmul.f32 %v3575_v61, %v674_v49 }
 0x1c0   : > { %v2760_v53 = vpop.eup %2759  ;;  %v614_v48 = vadd.f32 1e-05, %v582_v50  ;;  %2546 = vmatpush3.bf16.msra.mxu1 %v2731_v40  ;;  %1087 = vmatprep.mubr.bf16.mxu1 %v3042_v4  ;;  %v735_v8 = vmul.f32 %v3575_v61, %v697_v18  ;;  %v2734_v40 = vld [vmem:[#allocation7 + $0x80] ss:$12 sps:$4 sm:$0xff]  }
 0x1c1   : > { %v2762_v58 = vpop.eup %2761  ;;  %v615_v29 = vadd.f32 1e-05, %v583_v27  ;;  %v532_v6 = vpop.xlane.xlu1 %531  ;;  %2547 = vmatprep.subr.bf16.mxu1 %v2732_v41  ;;  %v3614_v12 = vpack.c.bf16 %v712_v10, %v711_v33  ;;  %v698_v30 = vmul.f32 %v2760_v53, %v3461_v9 }
 0x1c2   : > { %v534_v60 = vpop.xlane.xlu0 %533  ;;  %2771 = vrsqrt.f32 %v614_v48  ;;  %v584_v1 = vmul.f32 0.0078125, %v532_v6  ;;  %v675_v3 = vmul.f32 %v2762_v58, %v3468_v52 }
 0x1c3   : > { %968 = vmatmul.mubr.bf16.gmra.mrb[8].mxu0 %v3614_v12  ;;  %v736_v2 = vmul.f32 %v3575_v61, %v698_v30  ;;  %2773 = vrsqrt.f32 %v615_v29  ;;  %v585_v36 = vmul.f32 0.0078125, %v534_v60 }
 0x1c4   : > { %v2764_v31 = vpop.eup %2763  ;;  %v616_v56 = vadd.f32 1e-05, %v584_v1  ;;  %2548 = vmatpush3.bf16.msra.mxu1 %v2732_v41  ;;  %977 = vmatprep.mubr.bf16.mxu0 %v3042_v4  ;;  %v713_v52 = vmul.f32 %v3575_v61, %v675_v3 }
 0x1c5   : > { %v2766_v5 = vpop.eup %2765  ;;  %v536_v22 = vpop.xlane.xlu1 %535  ;;  %2549 = vmatprep.subr.bf16.mxu1 %v2733_v55  ;;  %v3622_v9 = vpack.c.bf16 %v736_v2, %v735_v8  ;;  %v676_v35 = vmul.f32 %v2764_v31, %v3471_v11  ;;  %v617_v41 = vadd.f32 1e-05, %v585_v36 }
 0x1c6   : > { %2775 = vrsqrt.f32 %v616_v56  ;;  %v586_v37 = vmul.f32 0.0078125, %v536_v22  ;;  %v538_v63 = vpop.xlane.xlu0 %537  ;;  %v699_v38 = vmul.f32 %v2766_v5, %v3478_v62 }
 0x1c7   : > { %1088 = vmatmul.mubr.bf16.gmra.mrb[8].mxu1 %v3622_v9  ;;  %v714_v14 = vmul.f32 %v3575_v61, %v676_v35  ;;  %v587_v58 = vmul.f32 0.0078125, %v538_v63 }
 0x1c8   : > { %v2768_v39 = vpop.eup %2767  ;;  %v618_v42 = vadd.f32 1e-05, %v586_v37  ;;  %2550 = vmatpush3.bf16.msra.mxu1 %v2733_v55  ;;  %1097 = vmatprep.mubr.bf16.mxu1 %v3042_v4  ;;  %v737_v49 = vmul.f32 %v3575_v61, %v699_v38 }
 0x1c9   : > { %v2770_v47 = vpop.eup %2769  ;;  %v540_v43 = vpop.xlane.xlu1 %539  ;;  %2551 = vmatprep.subr.bf16.mxu1 %v2734_v40  ;;  %v3630_v11 = vpack.c.bf16 %v714_v14, %v713_v52  ;;  %v700_v45 = vmul.f32 %v2768_v39, %v3481_v13  ;;  %v2736_v13 = vld [vmem:[#allocation7 + $0xb0] ss:$12 sps:$4 sm:$0xff]   ;;  %v619_v2 = vadd.f32 1e-05, %v587_v58 }
 0x1ca   : > { %v677_v50 = vmul.f32 %v2770_v47, %v3488_v34  ;;  %2777 = vrsqrt.f32 %v618_v42  ;;  %v588_v33 = vmul.f32 0.0078125, %v540_v43  ;;  %v542_v10 = vpop.xlane.xlu0 %541 }
 0x1cb   : > { %978 = vmatmul.mubr.bf16.gmra.mrb[12].mxu0 %v3630_v11  ;;  %v738_v62 = vmul.f32 %v3575_v61, %v700_v45  ;;  %2779 = vrsqrt.f32 %v617_v41  ;;  %v589_v31 = vmul.f32 0.0078125, %v542_v10 }
 0x1cc   : > { %v2772_v27 = vpop.eup %2771  ;;  %2552 = vmatpush3.bf16.msra.mxu1 %v2734_v40  ;;  %987 = vmatprep.mubr.bf16.mxu0 %v3042_v4  ;;  %v715_v34 = vmul.f32 %v3575_v61, %v677_v50  ;;  %v620_v55 = vadd.f32 1e-05, %v588_v33 }
 0x1cd   : > { %v544_v18 = vpop.xlane.xlu1 %543  ;;  %2553 = vmatprep.subr.bf16.mxu1 %v2735_v0  ;;  %v3638_v53 = vpack.c.bf16 %v738_v62, %v737_v49  ;;  %v678_v48 = vmul.f32 %v2772_v27, %v3491_v15  ;;  %v2774_v29 = vpop.eup %2773  ;;  %v621_v35 = vadd.f32 1e-05, %v589_v31 }
 0x1ce   : > { %v590_v30 = vmul.f32 0.0078125, %v544_v18  ;;  %v546_v3 = vpop.xlane.xlu0 %545  ;;  %v679_v56 = vmul.f32 %v2774_v29, %v3498_v44  ;;  %2781 = vrsqrt.f32 %v620_v55 }
 0x1cf   : > { %1098 = vmatmul.mubr.bf16.gmra.mrb[12].mxu1 %v3638_v53  ;;  %v716_v6 = vmul.f32 %v3575_v61, %v678_v48  ;;  %2783 = vrsqrt.f32 %v619_v2  ;;  %v591_v38 = vmul.f32 0.0078125, %v546_v3 }
 0x1d0   : > { %v2776_v60 = vpop.eup %2775  ;;  %2554 = vmatpush3.bf16.msra.mxu1 %v2735_v0  ;;  %2557 = vmatprep.mubr.bf16.mxu1 %v3581_v16  ;;  %v622_v5 = vadd.f32 1e-05, %v590_v30 }
 0x1d1   : > { %v548_v1 = vpop.xlane.xlu1 %547  ;;  %2555 = vmatprep.subr.bf16.mxu1 %v2736_v13  ;;  %v743_v8 = vpack.c.bf16 %v716_v6, %v715_v34  ;;  %v680_v15 = vmul.f32 %v2776_v60, %v3501_v17  ;;  %v717_v17 = vmul.f32 %v3575_v61, %v679_v56 }
 0x1d2   : > { %v592_v37 = vmul.f32 0.0078125, %v548_v1  ;;  %v550_v63 = vpop.xlane.xlu0 %549  ;;  %2785 = vrsqrt.f32 %v622_v5 }
 0x1d3   : > { %988 = vmatmul.mubr.bf16.gmra.mrb[16].mxu0 %v743_v8  ;;  %v718_v22 = vmul.f32 %v3575_v61, %v680_v15  ;;  %2787 = vrsqrt.f32 %v621_v35  ;;  %v593_v39 = vmul.f32 0.0078125, %v550_v63 }
 0x1d4   : > { %2556 = vmatpush3.bf16.msra.mxu1 %v2736_v13  ;;  %997 = vmatprep.mubr.bf16.mxu0 %v3042_v4  ;;  %v2778_v16 = vpop.eup %2777  ;;  %v624_v47 = vadd.f32 1e-05, %v592_v37 }
 0x1d5   : > { %v552_v40 = vpop.xlane.xlu1 %551  ;;  %v2780_v36 = vpop.eup %2779  ;;  %v744_v52 = vpack.c.bf16 %v718_v22, %v717_v17  ;;  %v682_v14 = vmul.f32 %v2778_v16, %v3511_v19  ;;  %v625_v41 = vadd.f32 1e-05, %v593_v39 }
 0x1d6   : > { %v594_v44 = vmul.f32 0.0078125, %v552_v40  ;;  %v681_v42 = vmul.f32 %v2780_v36, %v3508_v54  ;;  %v554_v49 = vpop.xlane.xlu0 %553  ;;  %2789 = vrsqrt.f32 %v624_v47 }
 0x1d7   : > { %2558 = vmatmul.mubr.bf16.vlgmr.msra.gmra.mrb[16].mxu1 %v3598_v32  ;;  %v720_v0 = vmul.f32 %v3575_v61, %v682_v14  ;;  %v595_v33 = vmul.f32 0.0078125, %v554_v49 }
 0x1d8   : > { %2561 = vmatprep.mubr.bf16.mxu1 %v3614_v12  ;;  %v626_v32 = vadd.f32 1e-05, %v594_v44  ;;  %v2782_v45 = vpop.eup %2781  ;;  %v623_v12 = vadd.f32 1e-05, %v591_v38  ;;  %v719_v19 = vmul.f32 %v3575_v61, %v681_v42 }
 0x1d9   : > { %v556_v43 = vpop.xlane.xlu1 %555  ;;  %v2784_v62 = vpop.eup %2783  ;;  %v684_v27 = vmul.f32 %v2782_v45, %v3521_v21  ;;  %v627_v58 = vadd.f32 1e-05, %v595_v33 }
 0x1da   : > { %v596_v50 = vmul.f32 0.0078125, %v556_v43  ;;  %2791 = vrsqrt.f32 %v626_v32  ;;  %v745_v54 = vpack.c.bf16 %v720_v0, %v719_v19  ;;  %v683_v18 = vmul.f32 %v2784_v62, %v3518_v20 }
 0x1db   : > { %998 = vmatmul.mubr.bf16.gmra.mrb[20].mxu0 %v744_v52  ;;  %2793 = vrsqrt.f32 %v623_v12  ;;  %v722_v48 = vmul.f32 %v3575_v61, %v684_v27 }
 0x1dc   : > { %1007 = vmatprep.mubr.bf16.mxu0 %v3042_v4  ;;  %v2786_v10 = vpop.eup %2785  ;;  %2795 = vrsqrt.f32 %v625_v41  ;;  %v628_v13 = vadd.f32 1e-05, %v596_v50  ;;  %v721_v34 = vmul.f32 %v3575_v61, %v683_v18 }
 0x1dd   : > { %v686_v29 = vmul.f32 %v2786_v10, %v3535_v7 }
 0x1de   : > { %2797 = vrsqrt.f32 %v628_v13  ;;  %v746_v6 = vpack.c.bf16 %v722_v48, %v721_v34 }
 0x1df   : > { %2562 = vmatmul.mubr.bf16.gmra.mrb[20].mxu1 %v3630_v11  ;;  %v2788_v11 = vpop.eup %2787  ;;  %2799 = vrsqrt.f32 %v627_v58  ;;  %v724_v20 = vmul.f32 %v3575_v61, %v686_v29 }
 0x1e0   : > { %2565 = vmatprep.mubr.bf16.mxu1 %v743_v8  ;;  %v685_v21 = vmul.f32 %v2788_v11, %v3532_v23  ;;  %v2790_v60 = vpop.eup %2789 }
 0x1e1   : > { %v688_v8 = vmul.f32 %v2790_v60, %v3546_v25 }
 0x1e2   : > { %v723_v1 = vmul.f32 %v3575_v61, %v685_v21 }
 0x1e3   : > { %1008 = vmatmul.mubr.bf16.gmra.mrb[24].mxu0 %v745_v54  ;;  %v726_v31 = vmul.f32 %v3575_v61, %v688_v8 }
 0x1e4   : > { %1017 = vmatprep.mubr.bf16.mxu0 %v3042_v4  ;;  %v2792_v55 = vpop.eup %2791  ;;  %v747_v15 = vpack.c.bf16 %v724_v20, %v723_v1 }
 0x1e5   : > { %v2794_v30 = vpop.eup %2793  ;;  %v690_v2 = vmul.f32 %v2792_v55, %v3556_v26 }
 0x1e6   : > { %v2796_v7 = vpop.eup %2795  ;;  %v687_v23 = vmul.f32 %v2794_v30, %v3543_v24 }
 0x1e7   : > { %2566 = vmatmul.mubr.bf16.gmra.mrb[24].mxu1 %v744_v52  ;;  %v689_v3 = vmul.f32 %v2796_v7, %v3553_v51  ;;  %v728_v5 = vmul.f32 %v3575_v61, %v690_v2 }
 0x1e8   : > { %2569 = vmatprep.mubr.bf16.mxu1 %v745_v54  ;;  %v2798_v56 = vpop.eup %2797  ;;  %v725_v22 = vmul.f32 %v3575_v61, %v687_v23 }
 0x1e9   : > { %v2800_v16 = vpop.eup %2799  ;;  %v727_v25 = vmul.f32 %v3575_v61, %v689_v3  ;;  %v692_v40 = vmul.f32 %v2798_v56, %v3566_v28 }
 0x1ea   : > { %v748_v26 = vpack.c.bf16 %v726_v31, %v725_v22  ;;  %v691_v51 = vmul.f32 %v2800_v16, %v3563_v59 }
 0x1eb   : > { %1018 = vmatmul.mubr.bf16.gmra.mrb[28].mxu0 %v746_v6  ;;  %v749_v24 = vpack.c.bf16 %v728_v5, %v727_v25  ;;  %v730_v35 = vmul.f32 %v3575_v61, %v692_v40 }
 0x1ec   : > { %1027 = vmatprep.mubr.bf16.mxu0 %v3042_v4  ;;  %v729_v17 = vmul.f32 %v3575_v61, %v691_v51 }
 0x1ee   : > { %v750_v36 = vpack.c.bf16 %v730_v35, %v729_v17 }
 0x1ef   : > { %2570 = vmatmul.mubr.bf16.gmra.mrb[28].mxu1 %v746_v6 }
 0x1f0   : > { %2573 = vmatprep.mubr.bf16.mxu1 %v747_v15 }
 0x1f3   : > { %1028 = vmatmul.mubr.bf16.gmra.mrb[32].mxu0 %v747_v15 }
 0x1f4   : > { %1037 = vmatprep.mubr.bf16.mxu0 %v3042_v4 }
 0x1f7   : > { %2574 = vmatmul.mubr.bf16.gmra.mrb[32].mxu1 %v748_v26 }
 0x1f8   : > { %2577 = vmatprep.mubr.bf16.mxu1 %v749_v24 }
 0x1fb   : > { %1038 = vmatmul.mubr.bf16.gmra.mrb[36].mxu0 %v748_v26 }
 0x1fc   : > { %1047 = vmatprep.mubr.bf16.mxu0 %v3042_v4 }
 0x1ff   : > { %2578 = vmatmul.mubr.bf16.gmra.mrb[36].mxu1 %v750_v36 }
 0x200   : > { %2581 = vmatprep.mubr.bf16.mxu1 %v3589_v57 }
 0x203   : > { %1048 = vmatmul.mubr.bf16.gmra.mrb[40].mxu0 %v749_v24 }
 0x204   : > { %1057 = vmatprep.mubr.bf16.mxu0 %v3042_v4 }
 0x207   : > { %2582 = vmatmul.mubr.bf16.gmra.mrb[40].mxu1 %v3606_v46 }
 0x208   : > { %2585 = vmatprep.mubr.bf16.mxu1 %v3622_v9 }
 0x20b   : > { %1058 = vmatmul.mubr.bf16.gmra.mrb[44].mxu0 %v750_v36 }
 0x20f   : > { %2586 = vmatmul.mubr.bf16.gmra.mrb[44].mxu1 %v3638_v53 }
 0x286   : > { %v949_v59 = vpop.f32.mrb[0].mxu0 }
 0x287   : > { %v951_v28 = vpop.f32.mrb[1].mxu0 }
 0x288   : > { %v953_v61 = vpop.f32.mrb[2].mxu0 }
 0x289   : > { %v2235_v37 = vpack.c.bf16 %v953_v61, %v949_v59  ;;  %v955_v63 = vpop.f32.mrb[3].mxu0 }
 0x28a   : > { %v2315_v57 = vpack.c.bf16 %v955_v63, %v951_v28  ;;  %v1069_v44 = vpop.f32.mrb[0].mxu1 }
 0x28b   : > { %2236 = vst [vmem:[%s3691_s6] sm:$0xff] %v2235_v37   ;;  %v1071_v4 = vpop.f32.mrb[1].mxu1 }
 0x28c   : > { %2316 = vst [vmem:[%s3695_s9] sm:$0xff] %v2315_v57   ;;  %v1073_v46 = vpop.f32.mrb[2].mxu1 }
 0x28d   : > { %v2295_v9 = vpack.c.bf16 %v1073_v46, %v1069_v44  ;;  %v1075_v53 = vpop.f32.mrb[3].mxu1 }
 0x28e   : > { %v2375_v52 = vpack.c.bf16 %v1075_v53, %v1071_v4  ;;  %v959_v14 = vpop.f32.mrb[4].mxu0 }
 0x28f   : > { %2483 = vst [vmem:[%s3691_s6 + $0x60] sm:$0xff] %v2295_v9   ;;  %v961_v38 = vpop.f32.mrb[5].mxu0 }
 0x290   : > { %2498 = vst [vmem:[%s3695_s9 + $0x60] sm:$0xff] %v2375_v52   ;;  %v963_v39 = vpop.f32.mrb[6].mxu0 }
 0x291   : > { %v2240_v42 = vpack.c.bf16 %v963_v39, %v959_v14  ;;  %v965_v47 = vpop.f32.mrb[7].mxu0 }
 0x292   : > { %v2320_v32 = vpack.c.bf16 %v965_v47, %v961_v38  ;;  %v1079_v43 = vpop.f32.mrb[4].mxu1 }
 0x293   : > { %2472 = vst [vmem:[%s3691_s6 + $0x8] sm:$0xff] %v2240_v42   ;;  %v1081_v0 = vpop.f32.mrb[5].mxu1 }
 0x294   : > { %2487 = vst [vmem:[%s3695_s9 + $0x8] sm:$0xff] %v2320_v32   ;;  %v1083_v45 = vpop.f32.mrb[6].mxu1 }
 0x295   : > { %v2300_v12 = vpack.c.bf16 %v1083_v45, %v1079_v43  ;;  %v1085_v41 = vpop.f32.mrb[7].mxu1 }
 0x296   : > { %v2380_v49 = vpack.c.bf16 %v1085_v41, %v1081_v0  ;;  %v969_v19 = vpop.f32.mrb[8].mxu0 }
 0x297   : > { %2484 = vst [vmem:[%s3691_s6 + $0x68] sm:$0xff] %v2300_v12   ;;  %v971_v62 = vpop.f32.mrb[9].mxu0 }
 0x298   : > { %2499 = vst [vmem:[%s3695_s9 + $0x68] sm:$0xff] %v2380_v49   ;;  %v973_v50 = vpop.f32.mrb[10].mxu0 }
 0x299   : > { %v2245_v54 = vpack.c.bf16 %v973_v50, %v969_v19  ;;  %v975_v27 = vpop.f32.mrb[11].mxu0 }
 0x29a   : > { %v2325_v33 = vpack.c.bf16 %v975_v27, %v971_v62  ;;  %v1089_v10 = vpop.f32.mrb[8].mxu1 }
 0x29b   : > { %2473 = vst [vmem:[%s3691_s6 + $0x10] sm:$0xff] %v2245_v54   ;;  %v1091_v18 = vpop.f32.mrb[9].mxu1 }
 0x29c   : > { %2488 = vst [vmem:[%s3695_s9 + $0x10] sm:$0xff] %v2325_v33   ;;  %v1093_v13 = vpop.f32.mrb[10].mxu1 }
 0x29d   : > { %v2305_v11 = vpack.c.bf16 %v1093_v13, %v1089_v10  ;;  %v1095_v48 = vpop.f32.mrb[11].mxu1 }
 0x29e   : > { %v2385_v58 = vpack.c.bf16 %v1095_v48, %v1091_v18  ;;  %v979_v29 = vpop.f32.mrb[12].mxu0 }
 0x29f   : > { %2485 = vst [vmem:[%s3691_s6 + $0x70] sm:$0xff] %v2305_v11   ;;  %v981_v34 = vpop.f32.mrb[13].mxu0 }
 0x2a0   : > { %2500 = vst [vmem:[%s3695_s9 + $0x70] sm:$0xff] %v2385_v58   ;;  %v983_v21 = vpop.f32.mrb[14].mxu0 }
 0x2a1   : > { %v2250_v6 = vpack.c.bf16 %v983_v21, %v979_v29  ;;  %v985_v60 = vpop.f32.mrb[15].mxu0 }
 0x2a2   : > { %v2330_v20 = vpack.c.bf16 %v985_v60, %v981_v34  ;;  %v1099_v55 = vpop.f32.mrb[12].mxu1 }
 0x2a3   : > { %2474 = vst [vmem:[%s3691_s6 + $0x18] sm:$0xff] %v2250_v6   ;;  %v1101_v30 = vpop.f32.mrb[13].mxu1 }
 0x2a4   : > { %2489 = vst [vmem:[%s3695_s9 + $0x18] sm:$0xff] %v2330_v20   ;;  %v1103_v1 = vpop.f32.mrb[14].mxu1 }
 0x2a5   : > { %v2310_v7 = vpack.c.bf16 %v1103_v1, %v1099_v55  ;;  %v1105_v8 = vpop.f32.mrb[15].mxu1 }
 0x2a6   : > { %v2390_v15 = vpack.c.bf16 %v1105_v8, %v1101_v30  ;;  %v989_v2 = vpop.f32.mrb[16].mxu0 }
 0x2a7   : > { %2486 = vst [vmem:[%s3691_s6 + $0x78] sm:$0xff] %v2310_v7   ;;  %v991_v23 = vpop.f32.mrb[17].mxu0 }
 0x2a8   : > { %2501 = vst [vmem:[%s3695_s9 + $0x78] sm:$0xff] %v2390_v15   ;;  %v993_v3 = vpop.f32.mrb[18].mxu0 }
 0x2a9   : > { %v2255_v31 = vpack.c.bf16 %v993_v3, %v989_v2  ;;  %v995_v56 = vpop.f32.mrb[19].mxu0 }
 0x2aa   : > { %v2335_v5 = vpack.c.bf16 %v995_v56, %v991_v23  ;;  %v2559_v22 = vpop.f32.mrb[16].mxu1 }
 0x2ab   : > { %2475 = vst [vmem:[%s3691_s6 + $0x20] sm:$0xff] %v2255_v31   ;;  %v1142_v16 = vpop.f32.mrb[17].mxu1 }
 0x2ac   : > { %2490 = vst [vmem:[%s3695_s9 + $0x20] sm:$0xff] %v2335_v5   ;;  %v2560_v25 = vpop.f32.mrb[18].mxu1 }
 0x2ad   : > { %v2400_v26 = vpack.c.bf16 %v2560_v25, %v2559_v22  ;;  %v1145_v40 = vpop.f32.mrb[19].mxu1 }
 0x2ae   : > { %v2395_v24 = vpack.c.bf16 %v1145_v40, %v1142_v16  ;;  %v999_v51 = vpop.f32.mrb[20].mxu0 }
 0x2af   : > { %2502 = vst [vmem:[%s3715_s8 + $0x8] sm:$0xff] %v2400_v26   ;;  %v1001_v35 = vpop.f32.mrb[21].mxu0 }
 0x2b0   : > { %2396 = vst [vmem:[%s3715_s8] sm:$0xff] %v2395_v24   ;;  %v1003_v17 = vpop.f32.mrb[22].mxu0 }
 0x2b1   : > { %v2260_v36 = vpack.c.bf16 %v1003_v17, %v999_v51  ;;  %v1005_v59 = vpop.f32.mrb[23].mxu0 }
 0x2b2   : > { %v2340_v28 = vpack.c.bf16 %v1005_v59, %v1001_v35  ;;  %v2563_v61 = vpop.f32.mrb[20].mxu1 }
 0x2b3   : > { %2476 = vst [vmem:[%s3691_s6 + $0x28] sm:$0xff] %v2260_v36   ;;  %v1158_v37 = vpop.f32.mrb[21].mxu1 }
 0x2b4   : > { %2491 = vst [vmem:[%s3695_s9 + $0x28] sm:$0xff] %v2340_v28   ;;  %v2564_v63 = vpop.f32.mrb[22].mxu1 }
 0x2b5   : > { %v2410_v57 = vpack.c.bf16 %v2564_v63, %v2563_v61  ;;  %v1161_v44 = vpop.f32.mrb[23].mxu1 }
 0x2b6   : > { %v2405_v4 = vpack.c.bf16 %v1161_v44, %v1158_v37  ;;  %v1009_v46 = vpop.f32.mrb[24].mxu0 }
 0x2b7   : > { %2504 = vst [vmem:[%s3715_s8 + $0x18] sm:$0xff] %v2410_v57   ;;  %v1011_v9 = vpop.f32.mrb[25].mxu0 }
 0x2b8   : > { %2503 = vst [vmem:[%s3715_s8 + $0x10] sm:$0xff] %v2405_v4   ;;  %v1013_v53 = vpop.f32.mrb[26].mxu0 }
 0x2b9   : > { %v2265_v52 = vpack.c.bf16 %v1013_v53, %v1009_v46  ;;  %v1015_v14 = vpop.f32.mrb[27].mxu0 }
 0x2ba   : > { %v2345_v38 = vpack.c.bf16 %v1015_v14, %v1011_v9  ;;  %v2567_v39 = vpop.f32.mrb[24].mxu1 }
 0x2bb   : > { %2477 = vst [vmem:[%s3691_s6 + $0x30] sm:$0xff] %v2265_v52   ;;  %v1174_v42 = vpop.f32.mrb[25].mxu1 }
 0x2bc   : > { %2492 = vst [vmem:[%s3695_s9 + $0x30] sm:$0xff] %v2345_v38   ;;  %v2568_v47 = vpop.f32.mrb[26].mxu1 }
 0x2bd   : > { %v2420_v32 = vpack.c.bf16 %v2568_v47, %v2567_v39  ;;  %v1177_v43 = vpop.f32.mrb[27].mxu1 }
 0x2be   : > { %v2415_v0 = vpack.c.bf16 %v1177_v43, %v1174_v42  ;;  %v1019_v45 = vpop.f32.mrb[28].mxu0 }
 0x2bf   : > { %2506 = vst [vmem:[%s3715_s8 + $0x28] sm:$0xff] %v2420_v32   ;;  %v1021_v12 = vpop.f32.mrb[29].mxu0 }
 0x2c0   : > { %2505 = vst [vmem:[%s3715_s8 + $0x20] sm:$0xff] %v2415_v0   ;;  %v1023_v41 = vpop.f32.mrb[30].mxu0 }
 0x2c1   : > { %v2270_v49 = vpack.c.bf16 %v1023_v41, %v1019_v45  ;;  %v1025_v19 = vpop.f32.mrb[31].mxu0 }
 0x2c2   : > { %v2350_v62 = vpack.c.bf16 %v1025_v19, %v1021_v12  ;;  %v2571_v50 = vpop.f32.mrb[28].mxu1 }
 0x2c3   : > { %2478 = vst [vmem:[%s3691_s6 + $0x38] sm:$0xff] %v2270_v49   ;;  %v1190_v54 = vpop.f32.mrb[29].mxu1 }
 0x2c4   : > { %2493 = vst [vmem:[%s3695_s9 + $0x38] sm:$0xff] %v2350_v62   ;;  %v2572_v27 = vpop.f32.mrb[30].mxu1 }
 0x2c5   : > { %v2430_v33 = vpack.c.bf16 %v2572_v27, %v2571_v50  ;;  %v1193_v10 = vpop.f32.mrb[31].mxu1 }
 0x2c6   : > { %v2425_v18 = vpack.c.bf16 %v1193_v10, %v1190_v54  ;;  %v1029_v13 = vpop.f32.mrb[32].mxu0 }
 0x2c7   : > { %2508 = vst [vmem:[%s3715_s8 + $0x38] sm:$0xff] %v2430_v33   ;;  %v1031_v11 = vpop.f32.mrb[33].mxu0 }
 0x2c8   : > { %2507 = vst [vmem:[%s3715_s8 + $0x30] sm:$0xff] %v2425_v18   ;;  %v1033_v48 = vpop.f32.mrb[34].mxu0 }
 0x2c9   : > { %v2275_v58 = vpack.c.bf16 %v1033_v48, %v1029_v13  ;;  %v1035_v29 = vpop.f32.mrb[35].mxu0 }
 0x2ca   : > { %v2355_v34 = vpack.c.bf16 %v1035_v29, %v1031_v11  ;;  %v2575_v21 = vpop.f32.mrb[32].mxu1 }
 0x2cb   : > { %2479 = vst [vmem:[%s3691_s6 + $0x40] sm:$0xff] %v2275_v58   ;;  %v1206_v6 = vpop.f32.mrb[33].mxu1 }
 0x2cc   : > { %2494 = vst [vmem:[%s3695_s9 + $0x40] sm:$0xff] %v2355_v34   ;;  %v2576_v60 = vpop.f32.mrb[34].mxu1 }
 0x2cd   : > { %v2440_v20 = vpack.c.bf16 %v2576_v60, %v2575_v21  ;;  %v1209_v55 = vpop.f32.mrb[35].mxu1 }
 0x2ce   : > { %v2435_v30 = vpack.c.bf16 %v1209_v55, %v1206_v6  ;;  %v1039_v1 = vpop.f32.mrb[36].mxu0 }
 0x2cf   : > { %2510 = vst [vmem:[%s3715_s8 + $0x48] sm:$0xff] %v2440_v20   ;;  %v1041_v7 = vpop.f32.mrb[37].mxu0 }
 0x2d0   : > { %2509 = vst [vmem:[%s3715_s8 + $0x40] sm:$0xff] %v2435_v30   ;;  %v1043_v8 = vpop.f32.mrb[38].mxu0 }
 0x2d1   : > { %v2280_v15 = vpack.c.bf16 %v1043_v8, %v1039_v1  ;;  %v1045_v2 = vpop.f32.mrb[39].mxu0 }
 0x2d2   : > { %v2360_v23 = vpack.c.bf16 %v1045_v2, %v1041_v7  ;;  %v2579_v3 = vpop.f32.mrb[36].mxu1 }
 0x2d3   : > { %2480 = vst [vmem:[%s3691_s6 + $0x48] sm:$0xff] %v2280_v15   ;;  %v1222_v31 = vpop.f32.mrb[37].mxu1 }
 0x2d4   : > { %2495 = vst [vmem:[%s3695_s9 + $0x48] sm:$0xff] %v2360_v23   ;;  %v2580_v56 = vpop.f32.mrb[38].mxu1 }
 0x2d5   : > { %v2450_v5 = vpack.c.bf16 %v2580_v56, %v2579_v3  ;;  %v1225_v22 = vpop.f32.mrb[39].mxu1 }
 0x2d6   : > { %v2445_v16 = vpack.c.bf16 %v1225_v22, %v1222_v31  ;;  %v1049_v25 = vpop.f32.mrb[40].mxu0 }
 0x2d7   : > { %2512 = vst [vmem:[%s3715_s8 + $0x58] sm:$0xff] %v2450_v5   ;;  %v1051_v26 = vpop.f32.mrb[41].mxu0 }
 0x2d8   : > { %2511 = vst [vmem:[%s3715_s8 + $0x50] sm:$0xff] %v2445_v16   ;;  %v1053_v40 = vpop.f32.mrb[42].mxu0 }
 0x2d9   : > { %v2285_v24 = vpack.c.bf16 %v1053_v40, %v1049_v25  ;;  %v1055_v51 = vpop.f32.mrb[43].mxu0 }
 0x2da   : > { %v2365_v35 = vpack.c.bf16 %v1055_v51, %v1051_v26  ;;  %v2583_v17 = vpop.f32.mrb[40].mxu1 }
 0x2db   : > { %2481 = vst [vmem:[%s3691_s6 + $0x50] sm:$0xff] %v2285_v24   ;;  %v1238_v36 = vpop.f32.mrb[41].mxu1 }
 0x2dc   : > { %2496 = vst [vmem:[%s3695_s9 + $0x50] sm:$0xff] %v2365_v35   ;;  %v2584_v59 = vpop.f32.mrb[42].mxu1 }
 0x2dd   : > { %v2460_v28 = vpack.c.bf16 %v2584_v59, %v2583_v17  ;;  %v1241_v61 = vpop.f32.mrb[43].mxu1 }
 0x2de   : > { %v2455_v37 = vpack.c.bf16 %v1241_v61, %v1238_v36  ;;  %v1059_v63 = vpop.f32.mrb[44].mxu0 }
 0x2df   : > { %2514 = vst [vmem:[%s3715_s8 + $0x68] sm:$0xff] %v2460_v28   ;;  %v1061_v57 = vpop.f32.mrb[45].mxu0 }
 0x2e0   : > { %2513 = vst [vmem:[%s3715_s8 + $0x60] sm:$0xff] %v2455_v37   ;;  %v1063_v44 = vpop.f32.mrb[46].mxu0 }
 0x2e1   : > { %v2290_v4 = vpack.c.bf16 %v1063_v44, %v1059_v63  ;;  %v1065_v46 = vpop.f32.mrb[47].mxu0 }
 0x2e2   : > { %v2370_v9 = vpack.c.bf16 %v1065_v46, %v1061_v57  ;;  %v3757_v53 = vpop.f32.mrb[44].mxu1 }
 0x2e3   : > { %2482 = vst [vmem:[%s3691_s6 + $0x58] sm:$0xff] %v2290_v4   ;;  %v3768_v52 = vpop.f32.mrb[45].mxu1 }
 0x2e4   : > { %2497 = vst [vmem:[%s3695_s9 + $0x58] sm:$0xff] %v2370_v9   ;;  %v2588_v14 = vpop.f32.mrb[46].mxu1 }
 0x2e5   : > { %2900 = shalt.err (!%p2897_p13)
}
 0x2e6   : > { %s2901_s6 = scalar_lea.hbm %s3753_s26, 2048  ;;  %s2905_s21 = scalar_lea.hbm %s3895_s3, 4096 }
 0x2e7   : > { %p2902_p4 = scmp.ne.s32.totalorder %s3753_s26, %s2901_s6  ;;  %p2906_p12 = scmp.lt.u32.totalorder %s3753_s26, %s3895_s3 }
 0x2e8   : > { %p2907_p2 = scmp.lt.u32.totalorder %s2905_s21, %s2901_s6  ;;  %p2909_p10 = scmp.lt.u32.totalorder %s2901_s6, %s3753_s26 }
 0x2e9   : > { %p2903_p5 = pnand %p2902_p4, %p3920_p11 }
 0x2ea   : > { %p2908_p7 = por %p2907_p2, %p2906_p12 }
 0x2eb   : > { %p2904_p8 = pneg %p2903_p5 }
 0x2ec   : > { %p2910_p1 = por %p2909_p10, %p2908_p7 }
 0x2ee   : > { %p2911_p0 = pnand %p2910_p1, %p2904_p8 }
 0x2f0   : > { %2914 = shalt.err (!%p2911_p0)
}
 0x2f1   : > { %s3044_s16 = smov 64   ;;  %s3045_s15 = smov 4   ;;  %v2470_v38 = vpack.c.bf16 %v2588_v14, %v3757_v53  ;;  %v1257_v39 = vpop.f32.mrb[47].mxu1 }
 0x2f2   : > { %2615 = dma.vmem_to_hbm [thread:$0]  (%p3920_p11), %s3755_s14, 2048, %s3753_s26, %s1750_s28, %s3044_s16, %s3044_s16, %s3045_s15  }
 0x2f3   : > { %s3921_s11 = sand.u32 1, %s3109_s24   ;;  %s2915_s9 = scalar_lea.vmem %s3765_s1, 2048 }
 0x2f4   : > { %s3802_s6 = scalar_lea.sflag [#allocation10], %s3921_s11  ;;  %p2916_p6 = scmp.ne.s32.totalorder %s3765_s1, %s2915_s9 }
 0x2f5   : > { %s3046_s17 = smov [#allocation9]  }
 0x2f6   : > { %p2917_p3 = pnand %p2916_p6, %p3920_p11  ;;  %s2919_s21 = sshll.u32 %s3046_s17, 4  ;;  %s2920_s21 = int_to_ptr.vmem [resolvable:$false] %s2919_s21 }
 0x2f7   : > { %s2921_s12 = scalar_lea.vmem %s2920_s21, 4096  ;;  %p2922_p13 = scmp.lt.s32.totalorder %s3765_s1, %s2920_s21 }
 0x2f8   : > { %p2918_p9 = pneg %p2917_p3  ;;  %p2923_p4 = scmp.lt.s32.totalorder %s2921_s12, %s2915_s9 }
 0x2fa   : > { %p2924_p5 = por %p2923_p4, %p2922_p13 }
 0x2fc   : > { %p2925_p8 = pnand %p2924_p5, %p2918_p9 }
 0x2fe   : > { %2928 = shalt.err (!%p2925_p8)
}
 0x2ff   : > { %s2929_s24 = scalar_lea.hbm %s3763_s13, 2048  ;;  %s2933_s26 = scalar_lea.hbm %s3896_s4, 4096 }
 0x300   : > { %p2930_p12 = scmp.ne.s32.totalorder %s3763_s13, %s2929_s24  ;;  %p2934_p10 = scmp.lt.u32.totalorder %s3763_s13, %s3896_s4 }
 0x301   : > { %p2935_p1 = scmp.lt.u32.totalorder %s2933_s26, %s2929_s24  ;;  %p2937_p6 = scmp.lt.u32.totalorder %s2929_s24, %s3763_s13 }
 0x302   : > { %p2931_p2 = pnand %p2930_p12, %p3920_p11 }
 0x303   : > { %p2936_p0 = por %p2935_p1, %p2934_p10 }
 0x304   : > { %p2932_p7 = pneg %p2931_p2 }
 0x305   : > { %p2938_p3 = por %p2937_p6, %p2936_p0 }
 0x307   : > { %p2939_p9 = pnand %p2938_p3, %p2932_p7 }
 0x309   : > { %2942 = shalt.err (!%p2939_p9)
}
 0x30a   : > { %2616 = dma.vmem_to_hbm [thread:$0]  (%p3920_p11), %s3765_s1, 2048, %s3763_s13, %s3802_s6, %s3044_s16, %s3044_s16, %s3045_s15   ;;  %v2465_v42 = vpack.c.bf16 %v1257_v39, %v3768_v52 }
 0x30b   : > { %s3834_s21 = scalar_lea.hbm %s3897_s5, %s3743_s25  ;;  %s3922_s12 = sshll.u32 %s3715_s8, 4  ;;  %2516 = vst [vmem:[%s3715_s8 + $0x78] sm:$0xff] %v2470_v38   ;;  %s3838_s12 = int_to_ptr.vmem [resolvable:$true] %s3922_s12 }
 0x30c   : > { %2515 = vst [vmem:[%s3715_s8 + $0x70] sm:$0xff] %v2465_v42   ;;  %s2943_s24 = scalar_lea.vmem %s3838_s12, 2048  ;;  %s3047_s1 = smov [#allocation11]  }
 0x30d   : > { %p2944_p13 = scmp.ne.s32.totalorder %s3838_s12, %s2943_s24  ;;  %s2947_s13 = sshll.u32 %s3047_s1, 4  ;;  %s2948_s13 = int_to_ptr.vmem [resolvable:$false] %s2947_s13 }
 0x30e   : > { %s2949_s10 = scalar_lea.vmem %s2948_s13, 4096  ;;  %p2950_p8 = scmp.lt.s32.totalorder %s3838_s12, %s2948_s13 }
 0x30f   : > { %p2945_p4 = pnand %p2944_p13, %p3920_p11  ;;  %p2951_p12 = scmp.lt.s32.totalorder %s2949_s10, %s2943_s24 }
 0x311   : > { %p2946_p5 = pneg %p2945_p4  ;;  %p2952_p2 = por %p2951_p12, %p2950_p8 }
 0x313   : > { %p2953_p7 = pnand %p2952_p2, %p2946_p5 }
 0x315   : > { %2956 = shalt.err (!%p2953_p7)
}
 0x316   : > { %s2957_s8 = scalar_lea.hbm %s3834_s21, 2048  ;;  %s2961_s26 = scalar_lea.hbm %s3897_s5, 4096 }
 0x317   : > { %p2958_p10 = scmp.ne.s32.totalorder %s3834_s21, %s2957_s8  ;;  %p2962_p6 = scmp.lt.u32.totalorder %s3834_s21, %s3897_s5 }
 0x318   : > { %p2963_p3 = scmp.lt.u32.totalorder %s2961_s26, %s2957_s8  ;;  %p2965_p13 = scmp.lt.u32.totalorder %s2957_s8, %s3834_s21 }
 0x319   : > { %p2959_p1 = pnand %p2958_p10, %p3920_p11 }
 0x31a   : > { %p2964_p9 = por %p2963_p3, %p2962_p6 }
 0x31b   : > { %p2960_p0 = pneg %p2959_p1 }
 0x31c   : > { %p2966_p4 = por %p2965_p13, %p2964_p9 }
 0x31e   : > { %p2967_p5 = pnand %p2966_p4, %p2960_p0 }
 0x320   : > { %2970 = shalt.err (!%p2967_p5)
}
 0x321   : > { %2617 = dma.vmem_to_hbm [thread:$0]  (%p3920_p11), %s3838_s12, 2048, %s3834_s21, %s3802_s6, %s3044_s16, %s3044_s16, %s3045_s15  }
 0x322 PF: > { %s1826_s9 = sand.u32 1, %s3013_s18   ;;  %p3923_p8 = scmp.ne.s32.totalorder %s3908_s30, 0 }
 0x323   : > { %p3924_p12 = scmp.ge.s32.totalorder %s3033_s23, 2  ;;  %s1827_s17 = scalar_lea.sflag [#allocation4], %s1826_s9 }
 0x325   : > { %p2633_p2 = pnand %p3924_p12, %p3923_p8 }
 0x327   : > { %3004 = dma.done.wait (!%p2633_p2), %s1827_s17, 2048  }
 0x328   : > { %3006 = vsyncadd (!%p2633_p2), %s1827_s17, 4294965248  ;;  %s3925_s29 = sadd.s32 4294967294, %s3033_s23  }
 0x329   : > { %s1835_s24 = sand.u32 1, %s3925_s29  }
 0x32a   : > { %s1836_s1 = scalar_lea.sflag [#allocation10], %s1835_s24 }
 0x32b   : > { %3008 = dma.done.wait (!%p2633_p2), %s1836_s1, 4096  }
 0x32c   : > { %3010 = vsyncadd (!%p2633_p2), %s1836_s1, 4294963200  ;;  %s26_s23 = sadd.s32 1, %s3033_s23   ;;  %s3926_s18 = smov %s3017_s19 }
 0x32d   : > { %p23_p11 = scmp.ge.s32.totalorder %s26_s23, 4   ;;  %s3927_s19 = smov %s3021_s20 }
 0x32e   : > { %s3928_s20 = smov %s3262_s7  ;;  %s3929_s21 = smov %s3029_s22 }
 0x32f   : > { %s3930_s22 = smov %s3932_s27  ;;  %25 = sbr.rel (!%p23_p11) target bundleno = 11 (0xb), region = 117 }
 0x336   :  { %1850 = vsyncpa [#allocation3], 1 }
 0x337   :  { %1852 = vsyncpa [#allocation3 + $0x1], 1 }
 0x338   :  { %1853 = vsyncpa [#allocation6], 1 }
 0x339   :  { %1854 = vsyncpa [#allocation4], 1 }
 0x33a   :  { %1856 = vsyncpa [#allocation4 + $0x1], 1 }
 0x33b   :  { %1857 = vsyncpa [#allocation10], 1 }
 0x33c   :  { %1859 = vsyncpa [#allocation10 + $0x1], 1 }

</bundles_post_ra>
